<compile_context>
chip_gen: v7x
topology: tpu7x:2x2x1
jax: 0.10.0
libtpu: 0.0.40
codegen_flags: <defaults>
</compile_context>

<pallas_src>
import functools

import jax
import jax.numpy as jnp
from jax.experimental import pallas as pl
from jax.experimental.pallas import tpu as pltpu


# ---------------------------------------------------------------------------
# Pallas kernel: fused (W @ X_cols) + optional residual + optional SoftThreshold
# ---------------------------------------------------------------------------
def _conv_mm_kernel(*refs, sub_mode, has_thr):
    # refs = (w_ref, x_ref, [res_ref], [thr_ref], out_ref)
    w_ref, x_ref = refs[0], refs[1]
    i = 2
    res_ref = None
    if sub_mode != 0:
        res_ref = refs[i]
        i += 1
    thr_ref = None
    if has_thr:
        thr_ref = refs[i]
        i += 1
    out_ref = refs[i]

    acc = jnp.dot(w_ref[...], x_ref[...],
                  preferred_element_type=jnp.float32,
                  precision=jax.lax.Precision.HIGHEST)          # MXU

    if sub_mode == 1:        # pre = res - acc   (gamma_k - apply_B(x_k - I))
        pre = res_ref[...] - acc
    elif sub_mode == 2:      # pre = acc - res   (apply_A(gamma_k) - I)
        pre = acc - res_ref[...]
    else:
        pre = acc

    if has_thr:              # torch SoftThreshold (per-output-channel threshold)
        t = thr_ref[...]                                   # (F, 1) broadcasts over L
        pre = jnp.where(pre > t, pre - t, 0.0) + jnp.where(pre < -t, pre + t, 0.0)

    out_ref[...] = pre.astype(out_ref.dtype)


def _conv_matmul(w_mat, x_cols, tl, res=None, thr=None, sub_mode=0):
    """out[n] = epilogue(w_mat @ x_cols[n]); L is pre-padded to a multiple of tl."""
    n_b, k_dim, l_pad = x_cols.shape
    f_out = w_mat.shape[0]
    assert l_pad % tl == 0

    inputs = [w_mat, x_cols]
    in_specs = [
        pl.BlockSpec((f_out, k_dim), lambda n, l: (0, 0)),          # weight: VMEM-resident
        pl.BlockSpec((None, k_dim, tl), lambda n, l: (n, 0, l)),    # im2col tile
    ]
    if sub_mode != 0:
        inputs.append(res)
        in_specs.append(pl.BlockSpec((None, f_out, tl), lambda n, l: (n, 0, l)))
    has_thr = thr is not None
    if has_thr:
        inputs.append(thr)
        in_specs.append(pl.BlockSpec((f_out, 1), lambda n, l: (0, 0)))

    kernel = functools.partial(_conv_mm_kernel, sub_mode=sub_mode, has_thr=has_thr)
    return pl.pallas_call(
        kernel,
        out_shape=jax.ShapeDtypeStruct((n_b, f_out, l_pad), jnp.float32),
        grid=(n_b, l_pad // tl),
        in_specs=in_specs,
        out_specs=pl.BlockSpec((None, f_out, tl), lambda n, l: (n, 0, l)),
        compiler_params=pltpu.CompilerParams(
            dimension_semantics=("parallel", "parallel")),
    )(*inputs)


# ---------------------------------------------------------------------------
# Wrapper-side layout plumbing (plain JAX, no heavy compute)
# ---------------------------------------------------------------------------
_LANE = 128
_MAX_TILE = 2048                 # lane-tile ceiling (keeps per-step VMEM modest)
_VMEM_BUDGET = 12 * 1024 * 1024  # conservative: fits v5e/v6e/v7x scoped defaults


def _round_up(x, m):
    return (x + m - 1) // m * m


def _choose_tile(l, k_dim, f_out, has_res):
    """Largest lane tile (multiple of 128) whose double-buffered working set fits."""
    per_lane_bytes = 2 * 4 * (k_dim + f_out + (f_out if has_res else 0))
    cap = (_VMEM_BUDGET // per_lane_bytes) // _LANE * _LANE
    cap = max(_LANE, min(_MAX_TILE, cap))
    if l <= cap:
        tl = _round_up(l, _LANE)
        return tl, tl
    return cap, _round_up(l, cap)


def _pad_last(a, l_pad):
    l = a.shape[-1]
    if l == l_pad:
        return a
    cfg = [(0, 0)] * (a.ndim - 1) + [(0, l_pad - l)]
    return jnp.pad(a, cfg)


def _pad_axis(a, axis, size):
    if a.shape[axis] == size:
        return a
    cfg = [(0, 0)] * a.ndim
    cfg[axis] = (0, size - a.shape[axis])
    return jnp.pad(a, cfg)


def _im2col(x, k, s):
    """(N,C,H,W) -> (N, C*k*k, OH*OW); tap order (c, di, dj) matches W.reshape(F, C*k*k)."""
    n, c, h, w = x.shape
    oh = (h - k) // s + 1
    ow = (w - k) // s + 1
    cols = []
    for di in range(k):
        for dj in range(k):
            patch = x[:, :, di:di + (oh - 1) * s + 1:s, dj:dj + (ow - 1) * s + 1:s]
            cols.append(patch.reshape(n, c, oh * ow))
    cols = jnp.stack(cols, axis=2)                 # (N, C, k*k, L)
    return cols.reshape(n, c * k * k, oh * ow), oh, ow


def _dilate_pad(g, s, k):
    """Zero-dilate by stride s and zero-pad by k-1 (ConvTranspose2d -> stride-1 conv)."""
    n, c, h, w = g.shape
    if s > 1:
        gd = jnp.zeros((n, c, (h - 1) * s + 1, (w - 1) * s + 1), g.dtype)
        gd = gd.at[:, :, ::s, ::s].set(g)
    else:
        gd = g
    return jnp.pad(gd, ((0, 0), (0, 0), (k - 1, k - 1), (k - 1, k - 1)))


def _calc_pad_sizes(shape, kernel_size, stride):
    h, w = shape[2], shape[3]
    left_pad = stride
    right_pad = 0 if (w + left_pad - kernel_size) % stride == 0 \
        else stride - (w + left_pad - kernel_size) % stride
    top_pad = stride
    bot_pad = 0 if (h + top_pad - kernel_size) % stride == 0 \
        else stride - (h + top_pad - kernel_size) % stride
    right_pad += stride
    bot_pad += stride
    return left_pad, right_pad, top_pad, bot_pad


def _split_image(I, kernel_size, stride):
    """stride>1: stride**2 reflect-padded shifted copies, batched (valids unused)."""
    if stride == 1:
        return I
    left_pad, right_pad, top_pad, bot_pad = _calc_pad_sizes(I.shape, kernel_size, stride)
    imgs = []
    for row_shift in range(stride):
        for col_shift in range(stride):
            cfg = ((0, 0), (0, 0),
                   (top_pad - row_shift, bot_pad + row_shift),
                   (left_pad - col_shift, right_pad + col_shift))
            imgs.append(jnp.pad(I, cfg, mode='reflect'))
    return jnp.stack(imgs, axis=1).reshape(-1, *imgs[0].shape[1:])


# ---------------------------------------------------------------------------
# ConvLista_T.forward
# ---------------------------------------------------------------------------
def conv_lista_t_forward(I, A_w, B_w, C_w, threshold, *, kernel_size, stride, unfoldings):
    k, s = kernel_size, stride
    c_in = I.shape[1]
    f = B_w.shape[0]
    c_pad = _round_up(c_in, 8)     # 31 -> 32: full sublane tiles everywhere
    f_pad = _round_up(f, 8)

    I_bp = _split_image(I, k, s)
    I_bp = _pad_axis(I_bp, 1, c_pad)                               # zero channels 31..c_pad-1
    n, _, hp, wp = I_bp.shape

    # Weights as matmul operands (channel-padded with zero rows/cols).
    w_b = _pad_axis(_pad_axis(B_w, 0, f_pad), 1, c_pad).reshape(f_pad, c_pad * k * k)
    w_a_t = jnp.transpose(A_w[:, :, ::-1, ::-1], (1, 0, 2, 3))     # (Cin, F, k, k)
    w_c_t = jnp.transpose(C_w[:, :, ::-1, ::-1], (1, 0, 2, 3))
    w_a = _pad_axis(_pad_axis(w_a_t, 0, c_pad), 1, f_pad).reshape(c_pad, f_pad * k * k)
    w_c = _pad_axis(_pad_axis(w_c_t, 0, c_pad), 1, f_pad).reshape(c_pad, f_pad * k * k)
    thr = _pad_axis(threshold.reshape(f, 1).astype(jnp.float32), 0, f_pad)

    h = (hp - k) // s + 1
    w = (wp - k) // s + 1
    l_g = h * w                      # code (gamma) spatial length
    l_i = hp * wp                    # image spatial length (convT output == hp, wp)
    tl_g, lp_g = _choose_tile(l_g, c_pad * k * k, f_pad, True)
    tl_i, lp_i = _choose_tile(l_i, f_pad * k * k, c_pad, True)

    # gamma_0 = soft_threshold(apply_B(I))              [conv + threshold fused]
    i_cols, _, _ = _im2col(I_bp, k, s)
    gamma = _conv_matmul(w_b, _pad_last(i_cols, lp_g), tl_g, thr=thr)          # (N, Fp, lp_g)

    i_flat = _pad_last(I_bp.reshape(n, c_pad, l_i), lp_i)

    for _ in range(unfoldings - 1):
        # x_k - I = apply_A(gamma_k) - I                [convT + subtract fused]
        g_img = gamma[:, :, :l_g].reshape(n, f_pad, h, w)
        g_cols, _, _ = _im2col(_dilate_pad(g_img, s, k), k, 1)
        d = _conv_matmul(w_a, _pad_last(g_cols, lp_i), tl_i,
                         res=i_flat, sub_mode=2)                               # (N, Cp, lp_i)
        # gamma = soft_threshold(gamma - apply_B(x_k - I))   [conv + update + threshold fused]
        d_img = d[:, :, :l_i].reshape(n, c_pad, hp, wp)
        d_cols, _, _ = _im2col(d_img, k, s)
        gamma = _conv_matmul(w_b, _pad_last(d_cols, lp_g), tl_g,
                             res=gamma, thr=thr, sub_mode=1)                   # (N, Fp, lp_g)

    # output_all = apply_C(gamma)
    g_img = gamma[:, :, :l_g].reshape(n, f_pad, h, w)
    g_cols, _, _ = _im2col(_dilate_pad(g_img, s, k), k, 1)
    out = _conv_matmul(w_c, _pad_last(g_cols, lp_i), tl_i)                     # (N, Cp, lp_i)
    return out[:, :c_in, :l_i].reshape(n, c_in, hp, wp)


# ---------------------------------------------------------------------------
# Pure-JAX reference (mirrors the PyTorch module op-for-op)
# ---------------------------------------------------------------------------
def _soft_threshold_ref(x, threshold):
    t = threshold.reshape(1, -1, 1, 1)
    return jnp.where(x > t, x - t, 0.0) + jnp.where(x < -t, x + t, 0.0)


def _conv2d_ref(x, w, s):
    return jax.lax.conv_general_dilated(
        x, w, window_strides=(s, s), padding='VALID',
        dimension_numbers=('NCHW', 'OIHW', 'NCHW'),
        precision=jax.lax.Precision.HIGHEST)


def _conv_transpose2d_ref(g, w, s):
    k = w.shape[-1]
    w2 = jnp.transpose(w[:, :, ::-1, ::-1], (1, 0, 2, 3))
    return jax.lax.conv_general_dilated(
        g, w2, window_strides=(1, 1), padding=[(k - 1, k - 1), (k - 1, k - 1)],
        lhs_dilation=(s, s), dimension_numbers=('NCHW', 'OIHW', 'NCHW'),
        precision=jax.lax.Precision.HIGHEST)


def _forward_ref(I, A_w, B_w, C_w, threshold, *, kernel_size, stride, unfoldings):
    I_bp = _split_image(I, kernel_size, stride)
    conv_input = _conv2d_ref(I_bp, B_w, stride)
    gamma = _soft_threshold_ref(conv_input, threshold)
    for _ in range(unfoldings - 1):
        x_k = _conv_transpose2d_ref(gamma, A_w, stride)
        r_k = _conv2d_ref(x_k - I_bp, B_w, stride)
        gamma = _soft_threshold_ref(gamma - r_k, threshold)
    return _conv_transpose2d_ref(gamma, C_w, stride)


if __name__ == "__main__":
    key = jax.random.PRNGKey(0)
    k_i, k_a, k_b, k_c = jax.random.split(key, 4)

    # ListaParams(kernel_size=3, num_filters=32, stride=1, unfoldings=3); 31-band input.
    ksz, nf, stride, unfold = 3, 32, 1, 3
    batch, c_in, hh, ww = 2, 31, 16, 16

    I = jax.random.normal(k_i, (batch, c_in, hh, ww), jnp.float32)
    scale = (c_in * ksz * ksz) ** -0.5
    A_w = scale * jax.random.normal(k_a, (nf, c_in, ksz, ksz), jnp.float32)
    B_w = scale * jax.random.normal(k_b, (nf, c_in, ksz, ksz), jnp.float32)
    C_w = scale * jax.random.normal(k_c, (nf, c_in, ksz, ksz), jnp.float32)
    thr = 0.01 * jnp.ones((nf,), jnp.float32)

    # stride = 1 path
    out = jax.block_until_ready(
        conv_lista_t_forward(I, A_w, B_w, C_w, thr,
                             kernel_size=ksz, stride=stride, unfoldings=unfold))
    ref = _forward_ref(I, A_w, B_w, C_w, thr,
                       kernel_size=ksz, stride=stride, unfoldings=unfold)
    assert out.shape == ref.shape == (batch, c_in, hh, ww), (out.shape, ref.shape)
    assert jnp.allclose(out, ref, atol=1e-3, rtol=1e-3), \
        float(jnp.max(jnp.abs(out - ref)))

    # stride = 2 path (exercises the reflect-padded _split_image batching too)
    out2 = jax.block_until_ready(
        conv_lista_t_forward(I, A_w, B_w, C_w, thr,
                             kernel_size=ksz, stride=2, unfoldings=unfold))
    ref2 = _forward_ref(I, A_w, B_w, C_w, thr,
                        kernel_size=ksz, stride=2, unfoldings=unfold)
    assert out2.shape == ref2.shape, (out2.shape, ref2.shape)
    assert jnp.allclose(out2, ref2, atol=1e-3, rtol=1e-3), \
        float(jnp.max(jnp.abs(out2 - ref2)))

    print("KERNEL_OK")
</pallas_src>

<mosaic_0001>
module attributes {stable_mosaic.version = 11 : i64} {
  func.func @_conv_mm_kernel(%arg0: i32, %arg1: i32, %arg2: memref<32x288xf32, #tpu.memory_space<vmem>>, %arg3: memref<1x288x256xf32, #tpu.memory_space<vmem>>, %arg4: memref<32x1xf32, #tpu.memory_space<vmem>>, %arg5: memref<1x32x256xf32, #tpu.memory_space<vmem>>) attributes {dimension_semantics = [#tpu.dimension_semantics<parallel>, #tpu.dimension_semantics<parallel>], iteration_bounds = array<i64: 2, 1>, scalar_prefetch = 0 : i64, scratch_operands = 0 : i64, tpu.core_type = #tpu.core_type<tc>, window_params = [{pipeline_mode = #tpu.pipeline_mode<synchronous>, transform_indices = @transform_0, window_bounds = array<i64: 32, 288>}, {transform_indices = @transform_1, window_bounds = array<i64: 1, 288, 256>}, {pipeline_mode = #tpu.pipeline_mode<synchronous>, transform_indices = @transform_2, window_bounds = array<i64: 32, 1>}, {transform_indices = @transform_3, window_bounds = array<i64: 1, 32, 256>}]} {
    %c0 = arith.constant 0 : index
    %c0_0 = arith.constant 0 : index
    %0 = vector.load %arg2[%c0, %c0_0] : memref<32x288xf32, #tpu.memory_space<vmem>>, vector<32x288xf32>
    %c0_1 = arith.constant 0 : index
    %c0_2 = arith.constant 0 : index
    %c0_3 = arith.constant 0 : index
    %1 = vector.load %arg3[%c0_1, %c0_2, %c0_3] : memref<1x288x256xf32, #tpu.memory_space<vmem>>, vector<1x288x256xf32>
    %2 = vector.shape_cast %1 : vector<1x288x256xf32> to vector<288x256xf32>
    %cst = arith.constant dense<0.000000e+00> : vector<32x256xf32>
    %3 = tpu.matmul %0, %2, %cst {dimension_numbers = #tpu.dot_dimension_numbers<[1], [0], [0], [1], [0, 0, 1, 1], [], []>, precision = #tpu.contract_precision<fp32>} : vector<32x288xf32>, vector<288x256xf32>, vector<32x256xf32> -> vector<32x256xf32>
    %c0_4 = arith.constant 0 : index
    %c0_5 = arith.constant 0 : index
    %4 = vector.load %arg4[%c0_4, %c0_5] : memref<32x1xf32, #tpu.memory_space<vmem>>, vector<32x1xf32>
    %5 = vector.broadcast %4 : vector<32x1xf32> to vector<32x256xf32>
    %6 = arith.cmpf ogt, %3, %5 : vector<32x256xf32>
    %7 = vector.broadcast %4 : vector<32x1xf32> to vector<32x256xf32>
    %8 = arith.subf %3, %7 : vector<32x256xf32>
    %cst_6 = arith.constant 0.000000e+00 : f32
    %9 = vector.broadcast %cst_6 : f32 to vector<32x256xf32>
    %10 = arith.select %6, %8, %9 : vector<32x256xi1>, vector<32x256xf32>
    %cst_7 = arith.constant 0.000000e+00 : f32
    %11 = vector.broadcast %cst_7 : f32 to vector<32x1xf32>
    %12 = arith.subf %11, %4 : vector<32x1xf32>
    %13 = vector.broadcast %12 : vector<32x1xf32> to vector<32x256xf32>
    %14 = arith.cmpf olt, %3, %13 : vector<32x256xf32>
    %15 = vector.broadcast %4 : vector<32x1xf32> to vector<32x256xf32>
    %16 = arith.addf %3, %15 : vector<32x256xf32>
    %cst_8 = arith.constant 0.000000e+00 : f32
    %17 = vector.broadcast %cst_8 : f32 to vector<32x256xf32>
    %18 = arith.select %14, %16, %17 : vector<32x256xi1>, vector<32x256xf32>
    %19 = arith.addf %10, %18 : vector<32x256xf32>
    %c0_9 = arith.constant 0 : index
    %c0_10 = arith.constant 0 : index
    %c0_11 = arith.constant 0 : index
    %20 = vector.load %arg5[%c0_9, %c0_10, %c0_11] : memref<1x32x256xf32, #tpu.memory_space<vmem>>, vector<1x32x256xf32>
    %21 = vector.shape_cast %20 : vector<1x32x256xf32> to vector<32x256xf32>
    %22 = vector.shape_cast %19 : vector<32x256xf32> to vector<1x32x256xf32>
    tpu.vector_store %arg5[%c0_9, %c0_10, %c0_11], %22 {strides = array<i32>} : memref<1x32x256xf32, #tpu.memory_space<vmem>>, vector<1x32x256xf32>,
    return
  }
  func.func @transform_0(%arg0: i32, %arg1: i32) -> (i32, i32) {
    %c0_i32 = arith.constant 0 : i32
    %c0_i32_0 = arith.constant 0 : i32
    %c0_i32_1 = arith.constant 0 : i32
    return %c0_i32, %c0_i32_0 : i32, i32
  }
  func.func @transform_1(%arg0: i32, %arg1: i32) -> (i32, i32, i32) {
    %c0_i32 = arith.constant 0 : i32
    %c0_i32_0 = arith.constant 0 : i32
    return %arg0, %c0_i32, %arg1 : i32, i32, i32
  }
  func.func @transform_2(%arg0: i32, %arg1: i32) -> (i32, i32) {
    %c0_i32 = arith.constant 0 : i32
    %c0_i32_0 = arith.constant 0 : i32
    %c0_i32_1 = arith.constant 0 : i32
    return %c0_i32, %c0_i32_0 : i32, i32
  }
  func.func @transform_3(%arg0: i32, %arg1: i32) -> (i32, i32, i32) {
    %c0_i32 = arith.constant 0 : i32
    %c0_i32_0 = arith.constant 0 : i32
    return %arg0, %c0_i32, %arg1 : i32, i32, i32
  }
}

</mosaic_0001>

<bundles_post_ra>
// kernel: tpu_custom_call.1
= control target key start
LH: loop header
LB: loop body
LE: loop exit
PB: predicated region body
PF: predicated region fallthrough
CT: control target
= control target key end

     0   :  { %8 = vsyncpa [#allocation3], 0  ;;  %s5067_s0 = inlined_call_operand.hbm [shape: f32[32,288], index: 0, kind: input, shape index: {}]   ;;  %s5068_s1 = inlined_call_operand.hbm [shape: f32[2,288,256], index: 1, kind: input, shape index: {}]   ;;  %s5069_s2 = inlined_call_operand.vmem [shape: f32[32,1], index: 2, kind: input, shape index: {}]   ;;  %s5070_s3 = inlined_call_operand.hbm [shape: f32[2,32,256], index: 3, kind: output, shape index: {}]  }
   0x1   :  { %9 = vsyncpa [#allocation6], 0 }
   0x2   :  { %11 = vsyncpa [#allocation6 + $0x1], 0 }
   0x3   :  { %12 = vsyncpa [#allocation4], 0 }
   0x4   :  { %14 = vsyncpa [#allocation4 + $0x1], 0  ;;  %s3506_s12 = smov 0   ;;  %s3508_s13 = smov 0  }
   0x5   :  { %s3510_s14 = smov 0   ;;  %s3512_s15 = smov 0  }
   0x6   :  { %s3514_s16 = smov 0   ;;  %s3516_s17 = smov 0  }
   0x7 LB: > { %s2708_s18 = sadd.s32 4294967295, %s3473_s17   ;;  %s2709_s19 = sadd.s32 4294967294, %s3473_s17   ;;  %s3473_s17 = sphi %s3516_s17, %s20_s17   ;;  %s3469_s16 = sphi %s3514_s16, %s5632_s16   ;;  %s3465_s15 = sphi %s3512_s15, %s5631_s15   ;;  %s3461_s14 = sphi %s3510_s14, %s5630_s14   ;;  %s3457_s13 = sphi %s3508_s13, %s5629_s13   ;;  %s3453_s12 = sphi %s3506_s12, %s5628_s12  }
   0x8   : > { %p75_p0 = scmp.ne.s32.totalorder %s3457_s13, %s3453_s12  ;;  %p3540_p1 = scmp.eq.s32.totalorder %s2708_s18, 0 }
   0x9   : > { %p3544_p2 = scmp.eq.s32.totalorder %s2708_s18, 1  ;;  %p128_p3 = scmp.eq.s32.totalorder %s2709_s19, 1 }
   0xa   : > { %s5266_s20 = scalar_select %p3540_p1, 1, 0 }
   0xb   : > { %s5267_s21 = scalar_select %p3544_p2, 1, 0 }
   0xc   : > { %p3550_p4 = por %p3540_p1, %p75_p0  ;;  %p2710_p5 = scmp.ge.s32.totalorder %s3473_s17, 1 }
   0xd   : > { %p3555_p6 = por %p128_p3, %p75_p0  ;;  %p135_p7 = scmp.lt.s32.totalorder %s3473_s17, 3 }
   0xe   : > { %s5268_s22 = scalar_select %p3550_p4, 1, 0 }
   0xf   : > { %s5269_s23 = scalar_select %p3555_p6, 1, 0 }
  0x10   : > { %p3560_p8 = pnand %p2710_p5, %p135_p7  ;;  %s3475_s25 = smov [#allocation2]  }
  0x11   : > { %s147_s26 = sshll.u32 %s3475_s25, 4  ;;  %s32_s28 = sadd.s32 1, %s3469_s16  ;;  %s148_s26 = int_to_ptr.vmem [resolvable:$true] %s147_s26 }
  0x12   : > { %s5270_s24 = scalar_select %p3560_p8, 1, 0 }
  0x13   : > { %p3254_p9 = pneg %p3560_p8  ;;  %s3329_s4 = scalar_lea.hbm %s5067_s0, 1536 }
  0x14   : > { %p3330_p12 = scmp.ne.s32.totalorder %s5067_s0, %s3329_s4  ;;  %p3336_p5 = scmp.lt.u32.totalorder %s3329_s4, %s5067_s0 }
  0x15   : > { %p3569_p11 = pnand %p3254_p9, %p3540_p1 }
  0x17   : > { %p3331_p13 = pneg %p3569_p11 }
  0x19   : > { %p3332_p0 = pnand %p3331_p13, %p3330_p12 }
  0x1b   : > { %p3333_p3 = pneg %p3332_p0 }
  0x1d   : > { %p3338_p7 = pnand %p3336_p5, %p3333_p3 }
  0x1f   : > { %3341 = shalt.err (!%p3338_p7)
}
  0x20   : > { %s3342_s9 = scalar_lea.vmem %s148_s26, 1536  ;;  %p3350_p4 = scmp.lt.s32.totalorder %s148_s26, %s148_s26 }
  0x21   : > { %p3343_p9 = scmp.ne.s32.totalorder %s148_s26, %s3342_s9  ;;  %p3351_p1 = scmp.lt.s32.totalorder %s3342_s9, %s3342_s9 }
  0x23   : > { %p3345_p10 = pnand %p3343_p9, %p3331_p13  ;;  %p3352_p8 = por %p3351_p1, %p3350_p4 }
  0x25   : > { %p3346_p6 = pneg %p3345_p10 }
  0x27   : > { %p3353_p2 = pnand %p3352_p8, %p3346_p6 }
  0x29   : > { %3356 = shalt.err (!%p3353_p2)
}
  0x2a   : > { %s3476_s10 = smov 384   ;;  %s3477_s11 = smov 24  }
  0x2b   : > { %3257 = dma.hbm_to_vmem [thread:$0]  (!%p3569_p11), %s5067_s0, 1536, %s148_s26, [#allocation3], %s3476_s10, %s3476_s10, %s3477_s11  }
  0x2c   : > { %p34_p1 = scmp.ge.s32.totalorder %s32_s28, 2  ;;  %s62_s25 = sadd.s32 1, %s3461_s14 }
  0x2d   : > { %p69_p2 = scmp.ne.s32.totalorder %s3461_s14, %s3457_s13  ;;  %p70_p4 = scmp.eq.s32.totalorder %s3473_s17, 0 }
  0x2e   : > { %s5634_s28 = smov (%p34_p1, %s32_s28), 0  ;;  %p5272_p8 = scmp.ne.s32.totalorder %s5267_s21, 0 }
  0x2f   : > { %p71_p6 = por %p70_p4, %p69_p2  ;;  %s57_s30 = ssub.s32 %s3469_s16, %s5634_s28 }
  0x30   : > { %p3598_p10 = por %p5272_p8, %p69_p2  ;;  %p3267_p12 = scmp.lt.s32.totalorder %s3473_s17, 2 }
  0x31   : > { %p60_p13 = scmp.eq.s32.totalorder %s57_s30, 0  ;;  %s164_s27 = sand.u32 1, %s3461_s14  }
  0x32   : > { %s3243_s4 = smul.u32 576, %s164_s27  ;;  %p3610_p11 = pnand %p3267_p12, %p71_p6 }
  0x33   : > { %s3607_s5 = scalar_select %p60_p13, %s3461_s14, %s62_s25  }
  0x34   : > { %s3244_s26 = smul.u32 9216, %s3469_s16  ;;  %s168_s6 = scalar_lea.vmem [#allocation5], %s3243_s4 }
  0x35   : > { %s177_s7 = sshll.u32 %s168_s6, 4  ;;  %s3621_s11 = scalar_lea.sflag [#allocation6], %s164_s27  ;;  %s3619_s7 = int_to_ptr.vmem [resolvable:$true] %s177_s7 }
  0x36   : > { %s3617_s10 = scalar_lea.hbm %s5068_s1, %s3244_s26  ;;  %p3359_p3 = pneg %p3610_p11 }
  0x37   : > { %s3357_s18 = scalar_lea.hbm %s3617_s10, 9216  ;;  %s3362_s30 = scalar_lea.hbm %s5068_s1, 18432 }
  0x38   : > { %p3358_p0 = scmp.ne.s32.totalorder %s3617_s10, %s3357_s18  ;;  %p3363_p9 = scmp.lt.u32.totalorder %s3617_s10, %s5068_s1 }
  0x39   : > { %p3364_p1 = scmp.lt.u32.totalorder %s3362_s30, %s3357_s18  ;;  %p3366_p4 = scmp.lt.u32.totalorder %s3357_s18, %s3617_s10 }
  0x3a   : > { %p3360_p5 = pnand %p3359_p3, %p3358_p0 }
  0x3b   : > { %p3365_p2 = por %p3364_p1, %p3363_p9 }
  0x3c   : > { %p3361_p7 = pneg %p3360_p5 }
  0x3d   : > { %p3367_p6 = por %p3366_p4, %p3365_p2 }
  0x3f   : > { %p3368_p8 = pnand %p3367_p6, %p3361_p7 }
  0x41   : > { %3371 = shalt.err (!%p3368_p8)
}
  0x42   : > { %s3372_s27 = scalar_lea.vmem %s3619_s7, 9216  ;;  %s3478_s6 = smov [#allocation5]  }
  0x43   : > { %p3373_p12 = scmp.ne.s32.totalorder %s3619_s7, %s3372_s27  ;;  %s3377_s9 = sshll.u32 %s3478_s6, 4  ;;  %s3378_s9 = int_to_ptr.vmem [resolvable:$false] %s3377_s9 }
  0x44   : > { %s3379_s21 = scalar_lea.vmem %s3378_s9, 18432  ;;  %p3380_p5 = scmp.lt.s32.totalorder %s3619_s7, %s3378_s9 }
  0x45   : > { %p3375_p13 = pnand %p3373_p12, %p3359_p3  ;;  %p3381_p9 = scmp.lt.s32.totalorder %s3379_s21, %s3372_s27 }
  0x47   : > { %p3376_p0 = pneg %p3375_p13  ;;  %p3382_p1 = por %p3381_p9, %p3380_p5 }
  0x49   : > { %p3383_p2 = pnand %p3382_p1, %p3376_p0 }
  0x4b   : > { %3386 = shalt.err (!%p3383_p2)
}
  0x4c   : > { %s3479_s18 = smov 256   ;;  %s3480_s19 = smov 16  }
  0x4d   : > { %3261 = dma.hbm_to_vmem [thread:$0]  (!%p3610_p11), %s3617_s10, 9216, %s3619_s7, %s3621_s11, %s3479_s18, %s3479_s18, %s3480_s19  }
  0x4e   : > { %p5275_p3 = scmp.ne.s32.totalorder %s5270_s24, 0 }
  0x50   : > { %189 = sbr.rel (%p5275_p3) target bundleno = 631 (0x277), region = 32 }
  0x57   : > { %p5276_p7 = scmp.ne.s32.totalorder %s5266_s20, 0 }
  0x59   : > { %3440 = dma.done.wait (%p5276_p7), [#allocation3], 1536  }
  0x5a   : > { %3442 = vsyncadd (%p5276_p7), [#allocation3], 4294965760  ;;  %s3656_s25 = sand.u32 1, %s3457_s13   ;;  %p5277_p11 = scmp.ne.s32.totalorder %s5268_s22, 0 }
  0x5b   : > { %s3245_s30 = smul.u32 576, %s3656_s25  ;;  %s196_s4 = scalar_lea.sflag [#allocation6], %s3656_s25 }
  0x5d   : > { %s3660_s26 = scalar_lea.vmem [#allocation5], %s3245_s30 }
  0x5e   : > { %3444 = dma.done.wait (%p5277_p11), %s196_s4, 9216  }
  0x5f   : > { %3446 = vsyncadd (%p5277_p11), %s196_s4, 4294958080  ;;  %v237_v0 = vld [vmem:[%s3660_s26 + $0x8] sm:$0xff]  ;;  %v239_v1 = vld [vmem:[%s3660_s26 + $0x18] sm:$0xff]  ;;  %vm308_vm0 = vcmask 261120   ;;  %s2716_s6 = sshll.u32 %s3656_s25, 6  ;;  %s2722_s21 = sshll.u32 %s3465_s15, 10 }
  0x60   : > { %v236_v2 = vld [vmem:[%s3660_s26] sm:$0xff]  ;;  %v321_v3 = vand.u32 4294901760, %v237_v0  ;;  %v325_v4 = vand.u32 4294901760, %v239_v1  ;;  %v238_v5 = vld [vmem:[%s3660_s26 + $0x10] sm:$0xff]  ;;  %v241_v7 = vld [vmem:[%s3660_s26 + $0x28] sm:$0xff]  ;;  %s4987_s9 = scalar_lea.vmem [#allocation7], %s2716_s6  ;;  %s5014_s4 = scalar_lea.hbm %s5070_s3, %s2722_s21 }
  0x61   : > { %v323_v6 = vand.u32 4294901760, %v236_v2  ;;  %v243_v8 = vld [vmem:[%s3660_s26 + $0x38] sm:$0xff]  ;;  %v327_v9 = vand.u32 4294901760, %v238_v5  ;;  %v329_v10 = vand.u32 4294901760, %v241_v7  ;;  %v240_v12 = vld [vmem:[%s3660_s26 + $0x20] sm:$0xff]  ;;  %v242_v13 = vld [vmem:[%s3660_s26 + $0x30] sm:$0xff] }
  0x62   : > { %v333_v11 = vand.u32 4294901760, %v243_v8  ;;  %v3674_v14 = vpack.c.bf16 %v325_v4, %v321_v3  ;;  %v3676_v15 = vsub.f32 %v237_v0, %v321_v3  ;;  %v3678_v16 = vsub.f32 %v239_v1, %v325_v4  ;;  %v245_v18 = vld [vmem:[%s3660_s26 + $0x48] sm:$0xff]  ;;  %v247_v19 = vld [vmem:[%s3660_s26 + $0x58] sm:$0xff]  ;;  %v244_v38 = vld [vmem:[%s3660_s26 + $0x40] sm:$0xff]  ;;  %s2609_s18 = sshll.u32 %s4987_s9, 4  ;;  %s2594_s15 = scalar_lea.sflag [#allocation4], %s3656_s25  ;;  %s5016_s18 = int_to_ptr.vmem [resolvable:$true] %s2609_s18 }
  0x63   : > { %v331_v17 = vand.u32 4294901760, %v240_v12  ;;  %v3682_v20 = vpack.c.bf16 %v327_v9, %v323_v6  ;;  %v3687_v22 = vsub.f32 %v241_v7, %v329_v10  ;;  %v335_v25 = vand.u32 4294901760, %v242_v13  ;;  %v246_v39 = vld [vmem:[%s3660_s26 + $0x50] sm:$0xff]  ;;  %v249_v40 = vld [vmem:[%s3660_s26 + $0x68] sm:$0xff]  ;;  %v251_v49 = vld [vmem:[%s3660_s26 + $0x78] sm:$0xff]  ;;  %s3483_s20 = smov [#allocation7]  }
  0x64   : > { %5278 = vst [vmem:[#allocation11_spill] sm:$0xff] %v3674_v14  ;;  %5279 = vst [vmem:[#allocation12_spill] sm:$0xff] %v3676_v15  ;;  %v3684_v21 = vpack.c.bf16 %v333_v11, %v329_v10  ;;  %2724 = vmatprep.subr.bf16.mxu1 %v3674_v14  ;;  %v516_v23 = vand.u32 4294901760, %v3676_v15  ;;  %v528_v24 = vand.u32 4294901760, %v3678_v16  ;;  %v3692_v26 = vsub.f32 %v236_v2, %v323_v6  ;;  %v248_v52 = vld [vmem:[%s3660_s26 + $0x60] sm:$0xff]  ;;  %v250_v59 = vld [vmem:[%s3660_s26 + $0x70] sm:$0xff] }
  0x65   : > { %5280 = vst [vmem:[#allocation13_spill] sm:$0xff] %v3678_v16  ;;  %5281 = vst [vmem:[#allocation14_spill] sm:$0xff] %v3682_v20  ;;  %2726 = vmatpush1.bf16.msra.mxu1 %v3682_v20  ;;  %v3694_v27 = vsub.f32 %v238_v5, %v327_v9  ;;  %v337_v28 = vand.u32 4294901760, %v245_v18  ;;  %v341_v29 = vand.u32 4294901760, %v247_v19  ;;  %v3697_v30 = vsub.f32 %v243_v8, %v333_v11  ;;  %v253_v0 = vld [vmem:[%s3660_s26 + $0x88] sm:$0xff]  ;;  %v255_v1 = vld [vmem:[%s3660_s26 + $0x98] sm:$0xff] }
  0x66   : > { %5282 = vst [vmem:[#allocation15_spill] sm:$0xff] %v3684_v21  ;;  %5283 = vst [vmem:[#allocation16_spill] sm:$0xff] %v3692_v26  ;;  %2728 = vmatprep.subr.bf16.mxu1 %v3684_v21  ;;  %v2979_v31 = vpack.c.bf16 %v528_v24, %v516_v23  ;;  %v3703_v32 = vpack.c.bf16 %v335_v25, %v331_v17  ;;  %v3705_v33 = vsub.f32 %v240_v12, %v331_v17  ;;  %v252_v12 = vld [vmem:[%s3660_s26 + $0x80] sm:$0xff]  ;;  %s3391_s22 = sshll.u32 %s3483_s20, 4  ;;  %s3392_s22 = int_to_ptr.vmem [resolvable:$false] %s3391_s22 }
  0x67   : > { %5284 = vst [vmem:[#allocation17_spill] sm:$0xff] %v3694_v27  ;;  %v3707_v34 = vsub.f32 %v242_v13, %v335_v25  ;;  %v522_v35 = vand.u32 4294901760, %v3692_v26  ;;  %v534_v36 = vand.u32 4294901760, %v3694_v27  ;;  %v3711_v37 = vpack.c.bf16 %v341_v29, %v337_v28  ;;  %v254_v25 = vld [vmem:[%s3660_s26 + $0x90] sm:$0xff]  ;;  %s3393_s24 = scalar_lea.vmem %s3392_s22, 2048  ;;  %p3394_p12 = scmp.lt.s32.totalorder %s5016_s18, %s3392_s22 }
  0x68   : > { %5285 = vst [vmem:[#allocation18_spill] sm:$0xff] %v3703_v32  ;;  %5286 = vst [vmem:[#allocation19_spill] sm:$0xff] %v3705_v33  ;;  %2980 = vmatprep.subr.bf16.mxu0 %v2979_v31  ;;  %v3717_v42 = vsub.f32 %v245_v18, %v337_v28  ;;  %v3719_v43 = vsub.f32 %v247_v19, %v341_v29  ;;  %v5080_v44 = vand.u32 4294901760, %v3687_v22  ;;  %v5079_v45 = vand.u32 4294901760, %v3697_v30 }
  0x69   : > { %5287 = vst [vmem:[#allocation20_spill] sm:$0xff] %v3707_v34  ;;  %5288 = vst [vmem:[#allocation21_spill] sm:$0xff] %v3711_v37  ;;  %2730 = vmatpush1.bf16.msra.mxu1 %v3703_v32  ;;  %v2981_v41 = vpack.c.bf16 %v534_v36, %v522_v35  ;;  %v339_v46 = vand.u32 4294901760, %v244_v38  ;;  %v343_v47 = vand.u32 4294901760, %v246_v39  ;;  %v546_v48 = vand.u32 4294901760, %v3705_v33 }
  0x6a   : > { %2732 = vmatprep.subr.bf16.mxu1 %v3711_v37  ;;  %v558_v50 = vand.u32 4294901760, %v3707_v34  ;;  %v345_v51 = vand.u32 4294901760, %v249_v40  ;;  %v2983_v53 = vpack.c.bf16 %v5079_v45, %v5080_v44  ;;  %v349_v58 = vand.u32 4294901760, %v251_v49  ;;  %v260_v45 = vld [vmem:[%s3660_s26 + $0xc0] sm:$0xff] }
  0x6b   : > { %2982 = vmatpush1.bf16.msra.mxu0 %v2981_v41  ;;  %v3732_v54 = vpack.c.bf16 %v343_v47, %v339_v46  ;;  %v3734_v55 = vsub.f32 %v244_v38, %v339_v46  ;;  %v3736_v56 = vsub.f32 %v246_v39, %v343_v47  ;;  %v5078_v61 = vand.u32 4294901760, %v3717_v42  ;;  %v257_v38 = vld [vmem:[%s3660_s26 + $0xa8] sm:$0xff]  ;;  %v259_v39 = vld [vmem:[%s3660_s26 + $0xb8] sm:$0xff] }
  0x6c   : > { %v2985_v57 = vpack.c.bf16 %v558_v50, %v546_v48  ;;  %2984 = vmatprep.subr.bf16.mxu0 %v2983_v53  ;;  %v3744_v60 = vsub.f32 %v249_v40, %v345_v51  ;;  %v5077_v62 = vand.u32 4294901760, %v3719_v43  ;;  %v347_v63 = vand.u32 4294901760, %v248_v52 }
  0x6d   : > { %5289 = vst [vmem:[#allocation22_spill] sm:$0xff] %v3732_v54  ;;  %5290 = vst [vmem:[#allocation23_spill] sm:$0xff] %v3734_v55  ;;  %2734 = vmatpush1.bf16.msra.mxu1 %v3732_v54  ;;  %v3750_v2 = vpack.c.bf16 %v349_v58, %v345_v51  ;;  %v3752_v3 = vsub.f32 %v251_v49, %v349_v58  ;;  %v351_v5 = vand.u32 4294901760, %v250_v59  ;;  %v570_v7 = vand.u32 4294901760, %v3734_v55  ;;  %v256_v58 = vld [vmem:[%s3660_s26 + $0xa0] sm:$0xff]  ;;  %v265_v51 = vld [vmem:[%s3660_s26 + $0xe8] sm:$0xff] }
  0x6e   : > { %5291 = vst [vmem:[#allocation24_spill] sm:$0xff] %v3736_v56  ;;  %v2987_v4 = vpack.c.bf16 %v5077_v62, %v5078_v61  ;;  %v3758_v6 = vsub.f32 %v248_v52, %v347_v63  ;;  %v582_v8 = vand.u32 4294901760, %v3736_v56  ;;  %v353_v9 = vand.u32 4294901760, %v253_v0 }
  0x6f   : > { %2986 = vmatpush1.bf16.msra.mxu0 %v2985_v57  ;;  %5292 = vst [vmem:[#allocation25_spill] sm:$0xff] %v3750_v2  ;;  %2736 = vmatprep.subr.bf16.mxu1 %v3750_v2  ;;  %v357_v10 = vand.u32 4294901760, %v255_v1  ;;  %v5076_v11 = vand.u32 4294901760, %v3744_v60  ;;  %v3768_v13 = vsub.f32 %v3676_v15, %v516_v23  ;;  %v3770_v17 = vpack.c.bf16 %v351_v5, %v347_v63  ;;  %v281_v2 = vld [vmem:[%s3660_s26 + $0x168] sm:$0xff] }
  0x70   : > { %5293 = vst [vmem:[#allocation26_spill] sm:$0xff] %v3758_v6  ;;  %2988 = vmatprep.subr.bf16.mxu0 %v2987_v4  ;;  %v3772_v18 = vsub.f32 %v250_v59, %v351_v5  ;;  %v5075_v19 = vand.u32 4294901760, %v3752_v3  ;;  %v3779_v28 = vsub.f32 %v3678_v16, %v528_v24  ;;  %v2989_v29 = vpack.c.bf16 %v582_v8, %v570_v7  ;;  %v258_v4 = vld [vmem:[%s3660_s26 + $0xb0] sm:$0xff]  ;;  %v261_v5 = vld [vmem:[%s3660_s26 + $0xc8] sm:$0xff] }
  0x71   : > { %5294 = vst [vmem:[#allocation27_spill] sm:$0xff] %v3770_v17  ;;  %v3785_v23 = vpack.c.bf16 %v357_v10, %v353_v9  ;;  %v3787_v31 = vsub.f32 %v253_v0, %v353_v9  ;;  %v3792_v40 = vsub.f32 %v3692_v26, %v522_v35  ;;  %v3795_v41 = vsub.f32 %v3694_v27, %v534_v36  ;;  %v262_v59 = vld [vmem:[%s3660_s26 + $0xd0] sm:$0xff]  ;;  %v268_v26 = vld [vmem:[%s3660_s26 + $0x100] sm:$0xff] }
  0x72   : > { %5295 = vst [vmem:[#allocation28_spill] sm:$0xff] %v3772_v18  ;;  %2738 = vmatpush1.bf16.msra.mxu1 %v3770_v17  ;;  %v2991_v24 = vpack.c.bf16 %v5075_v19, %v5076_v11  ;;  %v355_v46 = vand.u32 4294901760, %v252_v12  ;;  %v3803_v47 = vsub.f32 %v255_v1, %v357_v10  ;;  %v359_v35 = vand.u32 4294901760, %v254_v25 }
  0x73   : > { %5296 = vst [vmem:[#allocation29_spill] sm:$0xff] %v3785_v23  ;;  %2990 = vmatpush1.bf16.msra.mxu0 %v2989_v29  ;;  %2740 = vmatprep.subr.bf16.mxu1 %v3785_v23  ;;  %v5086_v49 = vand.u32 4294901760, %v3758_v6  ;;  %v5085_v36 = vand.u32 4294901760, %v3772_v18  ;;  %v361_v53 = vand.u32 4294901760, %v257_v38  ;;  %v365_v57 = vand.u32 4294901760, %v259_v39 }
  0x74   : > { %2992 = vmatprep.subr.bf16.mxu0 %v2991_v24  ;;  %v3808_v52 = vsub.f32 %v252_v12, %v355_v46  ;;  %v3812_v63 = vpack.c.bf16 %v359_v35, %v355_v46  ;;  %v3814_v0 = vsub.f32 %v254_v25, %v359_v35  ;;  %v5082_v1 = vand.u32 4294901760, %v3787_v31  ;;  %v263_v24 = vld [vmem:[%s3660_s26 + $0xd8] sm:$0xff] }
  0x75   : > { %v2993_v10 = vpack.c.bf16 %v5085_v36, %v5086_v49  ;;  %v3824_v12 = vpack.c.bf16 %v365_v57, %v361_v53  ;;  %v3826_v29 = vsub.f32 %v257_v38, %v361_v53  ;;  %v3831_v46 = vsub.f32 %v259_v39, %v365_v57  ;;  %v264_v36 = vld [vmem:[%s3660_s26 + $0xe0] sm:$0xff] }
  0x76   : > { %5297 = vst [vmem:[#allocation30_spill] sm:$0xff] %v3808_v52  ;;  %5298 = vst [vmem:[#allocation31_spill] sm:$0xff] %v3812_v63  ;;  %2742 = vmatpush1.bf16.msra.mxu1 %v3812_v63  ;;  %v5081_v35 = vand.u32 4294901760, %v3803_v47  ;;  %v363_v19 = vand.u32 4294901760, %v256_v58  ;;  %v367_v11 = vand.u32 4294901760, %v258_v4  ;;  %v5084_v38 = vand.u32 4294901760, %v3808_v52 }
  0x77   : > { %5299 = vst [vmem:[#allocation32_spill] sm:$0xff] %v3814_v0  ;;  %5300 = vst [vmem:[#allocation33_spill] sm:$0xff] %v3824_v12  ;;  %2994 = vmatpush1.bf16.msra.mxu0 %v2993_v10  ;;  %2744 = vmatprep.subr.bf16.mxu1 %v3824_v12  ;;  %v5083_v53 = vand.u32 4294901760, %v3814_v0  ;;  %v369_v62 = vand.u32 4294901760, %v261_v5  ;;  %v3840_v61 = vsub.f32 %v3705_v33, %v546_v48  ;;  %v373_v10 = vand.u32 4294901760, %v263_v24 }
  0x78   : > { %v2995_v39 = vpack.c.bf16 %v5081_v35, %v5082_v1  ;;  %v3846_v57 = vsub.f32 %v256_v58, %v363_v19  ;;  %v3852_v44 = vsub.f32 %v3707_v34, %v558_v50  ;;  %v3854_v25 = vpack.c.bf16 %v367_v11, %v363_v19 }
  0x79   : > { %v3856_v9 = vsub.f32 %v258_v4, %v367_v11  ;;  %v5092_v48 = vand.u32 4294901760, %v3826_v29  ;;  %v3864_v58 = vsub.f32 %v3734_v55, %v570_v7  ;;  %v2997_v50 = vpack.c.bf16 %v5083_v53, %v5084_v38  ;;  %v267_v11 = vld [vmem:[%s3660_s26 + $0xf8] sm:$0xff]  ;;  %v266_v55 = vld [vmem:[%s3660_s26 + $0xf0] sm:$0xff] }
  0x7a   : > { %5301 = vst [vmem:[#allocation34_spill] sm:$0xff] %v3846_v57  ;;  %5302 = vst [vmem:[#allocation35_spill] sm:$0xff] %v3854_v25  ;;  %2996 = vmatprep.subr.bf16.mxu0 %v2995_v39  ;;  %v3870_v35 = vpack.c.bf16 %v373_v10, %v369_v62  ;;  %v3872_v19 = vsub.f32 %v261_v5, %v369_v62  ;;  %v3878_v4 = vsub.f32 %v3736_v56, %v582_v8  ;;  %v269_v8 = vld [vmem:[%s3660_s26 + $0x108] sm:$0xff] }
  0x7b   : > { %5303 = vst [vmem:[#allocation36_spill] sm:$0xff] %v3856_v9  ;;  %2746 = vmatpush1.bf16.msra.mxu1 %v3854_v25  ;;  %v3881_v7 = vsub.f32 %v263_v24, %v373_v10  ;;  %v5091_v39 = vand.u32 4294901760, %v3831_v46  ;;  %v371_v1 = vand.u32 4294901760, %v260_v45  ;;  %2998 = vmatpush1.bf16.msra.mxu0 %v2997_v50  ;;  %v375_v62 = vand.u32 4294901760, %v262_v59  ;;  %v274_v25 = vld [vmem:[%s3660_s26 + $0x130] sm:$0xff] }
  0x7c   : > { %5304 = vst [vmem:[#allocation37_spill] sm:$0xff] %v3870_v35  ;;  %2748 = vmatprep.subr.bf16.mxu1 %v3870_v35  ;;  %v377_v38 = vand.u32 4294901760, %v265_v51  ;;  %v381_v50 = vand.u32 4294901760, %v267_v11  ;;  %v5103_v53 = vand.u32 4294901760, %v3872_v19  ;;  %v5309_v33 = vand.u32 4294901760, %v3846_v57 }
  0x7d   : > { %5305 = vst [vmem:[#allocation38_spill] sm:$0xff] %v3881_v7  ;;  %v2999_v24 = vpack.c.bf16 %v5091_v39, %v5092_v48  ;;  %v3892_v10 = vsub.f32 %v260_v45, %v371_v1  ;;  %v3896_v56 = vpack.c.bf16 %v375_v62, %v371_v1  ;;  %v3898_v5 = vsub.f32 %v262_v59, %v375_v62  ;;  %v271_v1 = vld [vmem:[%s3660_s26 + $0x118] sm:$0xff] }
  0x7e   : > { %v5310_v45 = vand.u32 4294901760, %v3856_v9  ;;  %v3908_v48 = vpack.c.bf16 %v381_v50, %v377_v38  ;;  %v3910_v27 = vsub.f32 %v265_v51, %v377_v38  ;;  %v3915_v62 = vsub.f32 %v267_v11, %v381_v50 }
  0x7f   : > { %5306 = vst [vmem:[#allocation39_spill] sm:$0xff] %v3892_v10  ;;  %5307 = vst [vmem:[#allocation40_spill] sm:$0xff] %v3896_v56  ;;  %3000 = vmatprep.subr.bf16.mxu0 %v2999_v24  ;;  %2750 = vmatpush1.bf16.msra.mxu1 %v3896_v56  ;;  %v5102_v34 = vand.u32 4294901760, %v3881_v7  ;;  %v379_v24 = vand.u32 4294901760, %v264_v36  ;;  %v5314_v59 = vand.u32 4294901760, %v3758_v6  ;;  %v389_v50 = vand.u32 4294901760, %v271_v1 }
  0x80   : > { %5308 = vst [vmem:[#allocation41_spill] sm:$0xff] %v3898_v5  ;;  %v3001_v39 = vpack.c.bf16 %v5310_v45, %v5309_v33  ;;  %5311 = vst [vmem:[#allocation42_spill] sm:$0xff] %v3908_v48  ;;  %2752 = vmatprep.subr.bf16.mxu1 %v3908_v48  ;;  %v383_v33 = vand.u32 4294901760, %v266_v55  ;;  %v385_v45 = vand.u32 4294901760, %v269_v8  ;;  %v5316_v51 = vand.u32 4294901760, %v3772_v18  ;;  %v273_v48 = vld [vmem:[%s3660_s26 + $0x128] sm:$0xff] }
  0x81   : > { %5312 = vst [vmem:[#allocation43_spill] sm:$0xff] %v3910_v27  ;;  %5313 = vst [vmem:[#allocation44_spill] sm:$0xff] %v3915_v62  ;;  %v3924_v49 = vsub.f32 %v3758_v6, %v5314_v59  ;;  %v3003_v11 = vpack.c.bf16 %v5102_v34, %v5103_v53  ;;  %v270_v6 = vld [vmem:[%s3660_s26 + $0x110] sm:$0xff]  ;;  %v5319_v56 = vand.u32 4294901760, %v3808_v52  ;;  %v5320_v34 = vand.u32 4294901760, %v3892_v10 }
  0x82   : > { %3002 = vmatpush1.bf16.msra.mxu0 %v3001_v39  ;;  %v3930_v39 = vsub.f32 %v264_v36, %v379_v24  ;;  %v3936_v38 = vsub.f32 %v3772_v18, %v5316_v51  ;;  %v3938_v16 = vpack.c.bf16 %v383_v33, %v379_v24  ;;  %v3940_v15 = vsub.f32 %v266_v55, %v383_v33  ;;  %v275_v55 = vld [vmem:[%s3660_s26 + $0x138] sm:$0xff] }
  0x83   : > { %v3948_v36 = vsub.f32 %v3808_v52, %v5319_v56  ;;  %3004 = vmatprep.subr.bf16.mxu0 %v3003_v11  ;;  %v5321_v53 = vand.u32 4294901760, %v3898_v5  ;;  %v3954_v18 = vpack.c.bf16 %v389_v50, %v385_v45  ;;  %v3956_v24 = vsub.f32 %v269_v8, %v385_v45 }
  0x84   : > { %5315 = vst [vmem:[#allocation45_spill] sm:$0xff] %v3930_v39  ;;  %5317 = vst [vmem:[#allocation46_spill] sm:$0xff] %v3938_v16  ;;  %v5324_v33 = vand.u32 4294901760, %v3814_v0  ;;  %2754 = vmatpush1.bf16.msra.mxu1 %v3938_v16  ;;  %v3965_v56 = vsub.f32 %v271_v1, %v389_v50  ;;  %v5119_v11 = vand.u32 4294901760, %v3915_v62  ;;  %v387_v52 = vand.u32 4294901760, %v268_v26  ;;  %v272_v16 = vld [vmem:[%s3660_s26 + $0x120] sm:$0xff] }
  0x85   : > { %5318 = vst [vmem:[#allocation47_spill] sm:$0xff] %v3940_v15  ;;  %v3005_v51 = vpack.c.bf16 %v5321_v53, %v5320_v34  ;;  %5322 = vst [vmem:[#allocation48_spill] sm:$0xff] %v3954_v18  ;;  %2756 = vmatprep.subr.bf16.mxu1 %v3954_v18  ;;  %v391_v34 = vand.u32 4294901760, %v270_v6  ;;  %v393_v45 = vand.u32 4294901760, %v273_v48  ;;  %v5134_v8 = vand.u32 4294901760, %v3956_v24 }
  0x86   : > { %5323 = vst [vmem:[#allocation49_spill] sm:$0xff] %v3956_v24  ;;  %v3962_v59 = vsub.f32 %v3814_v0, %v5324_v33  ;;  %5325 = vst [vmem:[#allocation50_spill] sm:$0xff] %v3965_v56  ;;  %v5326_v0 = vand.u32 4294901760, %v3910_v27  ;;  %v3976_v50 = vsub.f32 %v268_v26, %v387_v52  ;;  %v277_v33 = vld [vmem:[%s3660_s26 + $0x148] sm:$0xff]  ;;  %v5330_v63 = vand.u32 4294901760, %v3930_v39  ;;  %v282_v24 = vld [vmem:[%s3660_s26 + $0x170] sm:$0xff] }
  0x87   : > { %3006 = vmatpush1.bf16.msra.mxu0 %v3005_v51  ;;  %v397_v51 = vand.u32 4294901760, %v275_v55  ;;  %v3980_v35 = vpack.c.bf16 %v391_v34, %v387_v52  ;;  %v3982_v53 = vsub.f32 %v270_v6, %v391_v34  ;;  %v5331_v26 = vand.u32 4294901760, %v3940_v15  ;;  %v279_v52 = vld [vmem:[%s3660_s26 + $0x158] sm:$0xff]  ;;  %v290_v27 = vld [vmem:[%s3660_s26 + $0x1b0] sm:$0xff] }
  0x88   : > { %v3007_v1 = vpack.c.bf16 %v5119_v11, %v5326_v0  ;;  %5327 = vst [vmem:[#allocation51_spill] sm:$0xff] %v3976_v50  ;;  %v3994_v23 = vsub.f32 %v273_v48, %v393_v45  ;;  %v5133_v12 = vand.u32 4294901760, %v3965_v56  ;;  %v5335_v6 = vand.u32 4294901760, %v3846_v57 }
  0x89   : > { %5328 = vst [vmem:[#allocation52_spill] sm:$0xff] %v3980_v35  ;;  %5329 = vst [vmem:[#allocation53_spill] sm:$0xff] %v3982_v53  ;;  %v3009_v0 = vpack.c.bf16 %v5331_v26, %v5330_v63  ;;  %v3992_v11 = vpack.c.bf16 %v397_v51, %v393_v45  ;;  %2758 = vmatpush1.bf16.msra.mxu1 %v3980_v35  ;;  %v3999_v34 = vsub.f32 %v275_v55, %v397_v51 }
  0x8a   : > { %3008 = vmatprep.subr.bf16.mxu0 %v3007_v1  ;;  %5333 = vst [vmem:[#allocation55_spill] sm:$0xff] %v3994_v23  ;;  %v395_v1 = vand.u32 4294901760, %v272_v16  ;;  %v399_v63 = vand.u32 4294901760, %v274_v25  ;;  %v401_v26 = vand.u32 4294901760, %v277_v33  ;;  %v4008_v18 = vsub.f32 %v3846_v57, %v5335_v6  ;;  %v278_v57 = vld [vmem:[%s3660_s26 + $0x150] sm:$0xff] }
  0x8b   : > { %5332 = vst [vmem:[#allocation54_spill] sm:$0xff] %v3992_v11  ;;  %5334 = vst [vmem:[#allocation56_spill] sm:$0xff] %v3999_v34  ;;  %3010 = vmatpush1.bf16.msra.mxu0 %v3009_v0  ;;  %2760 = vmatprep.subr.bf16.mxu1 %v3992_v11  ;;  %v3011_v55 = vpack.c.bf16 %v5133_v12, %v5134_v8  ;;  %v405_v0 = vand.u32 4294901760, %v279_v52  ;;  %v276_v11 = vld [vmem:[%s3660_s26 + $0x140] sm:$0xff]  ;;  %v5337_v48 = vand.u32 4294901760, %v3856_v9  ;;  %v5340_v54 = vand.u32 4294901760, %v3892_v10 }
  0x8c   : > { %v4014_v51 = vsub.f32 %v272_v16, %v395_v1  ;;  %v4022_v35 = vpack.c.bf16 %v399_v63, %v395_v1  ;;  %v4024_v17 = vsub.f32 %v274_v25, %v399_v63  ;;  %v5341_v12 = vand.u32 4294901760, %v3976_v50  ;;  %v283_v25 = vld [vmem:[%s3660_s26 + $0x178] sm:$0xff] }
  0x8d   : > { %v4020_v45 = vsub.f32 %v3856_v9, %v5337_v48  ;;  %v4032_v16 = vsub.f32 %v3892_v10, %v5340_v54  ;;  %3012 = vmatprep.subr.bf16.mxu0 %v3011_v55  ;;  %v5342_v8 = vand.u32 4294901760, %v3982_v53  ;;  %v4038_v9 = vpack.c.bf16 %v405_v0, %v401_v26 }
  0x8e   : > { %5336 = vst [vmem:[#allocation57_spill] sm:$0xff] %v4014_v51  ;;  %5338 = vst [vmem:[#allocation58_spill] sm:$0xff] %v4022_v35  ;;  %v4040_v1 = vsub.f32 %v277_v33, %v401_v26  ;;  %v5345_v63 = vand.u32 4294901760, %v3898_v5  ;;  %2762 = vmatpush1.bf16.msra.mxu1 %v4022_v35  ;;  %v4049_v54 = vsub.f32 %v279_v52, %v405_v0  ;;  %v5150_v55 = vand.u32 4294901760, %v3999_v34  ;;  %v280_v35 = vld [vmem:[%s3660_s26 + $0x160] sm:$0xff] }
  0x8f   : > { %5339 = vst [vmem:[#allocation59_spill] sm:$0xff] %v4024_v17  ;;  %v3013_v48 = vpack.c.bf16 %v5342_v8, %v5341_v12  ;;  %5343 = vst [vmem:[#allocation60_spill] sm:$0xff] %v4038_v9  ;;  %v403_v10 = vand.u32 4294901760, %v276_v11  ;;  %2764 = vmatprep.subr.bf16.mxu1 %v4038_v9  ;;  %v407_v12 = vand.u32 4294901760, %v278_v57  ;;  %v409_v26 = vand.u32 4294901760, %v281_v2 }
  0x90   : > { %5344 = vst [vmem:[#allocation61_spill] sm:$0xff] %v4040_v1  ;;  %v4046_v6 = vsub.f32 %v3898_v5, %v5345_v63  ;;  %5347 = vst [vmem:[#allocation63_spill] sm:$0xff] %v4049_v54  ;;  %v5348_v5 = vand.u32 4294901760, %v3994_v23  ;;  %v5165_v33 = vand.u32 4294901760, %v4040_v1  ;;  %v285_v63 = vld [vmem:[%s3660_s26 + $0x188] sm:$0xff]  ;;  %v5352_v34 = vand.u32 4294901760, %v4014_v51 }
  0x91   : > { %3014 = vmatpush1.bf16.msra.mxu0 %v3013_v48  ;;  %v4060_v0 = vsub.f32 %v276_v11, %v403_v10  ;;  %v413_v48 = vand.u32 4294901760, %v283_v25  ;;  %v4064_v56 = vpack.c.bf16 %v407_v12, %v403_v10  ;;  %v4066_v8 = vsub.f32 %v278_v57, %v407_v12  ;;  %v287_v10 = vld [vmem:[%s3660_s26 + $0x198] sm:$0xff]  ;;  %v289_v1 = vld [vmem:[%s3660_s26 + $0x1a8] sm:$0xff] }
  0x92   : > { %5346 = vst [vmem:[#allocation62_spill] sm:$0xff] %v4046_v6  ;;  %v3015_v52 = vpack.c.bf16 %v5150_v55, %v5348_v5  ;;  %v5353_v5 = vand.u32 4294901760, %v4024_v17  ;;  %v4078_v37 = vsub.f32 %v281_v2, %v409_v26  ;;  %v5164_v23 = vand.u32 4294901760, %v4049_v54  ;;  %v225_v6 = vld [vmem:[#allocation2 + $0x8] sm:$0xff] }
  0x93   : > { %5349 = vst [vmem:[#allocation64_spill] sm:$0xff] %v4060_v0  ;;  %5350 = vst [vmem:[#allocation65_spill] sm:$0xff] %v4064_v56  ;;  %v4076_v55 = vpack.c.bf16 %v413_v48, %v409_v26  ;;  %2766 = vmatpush1.bf16.msra.mxu1 %v4064_v56  ;;  %v4083_v12 = vsub.f32 %v283_v25, %v413_v48  ;;  %v5357_v57 = vand.u32 4294901760, %v3930_v39  ;;  %v5360_v2 = vand.u32 4294901760, %v3940_v15 }
  0x94   : > { %5351 = vst [vmem:[#allocation66_spill] sm:$0xff] %v4066_v8  ;;  %3016 = vmatprep.subr.bf16.mxu0 %v3015_v52  ;;  %v3017_v11 = vpack.c.bf16 %v5353_v5, %v5352_v34  ;;  %5355 = vst [vmem:[#allocation68_spill] sm:$0xff] %v4078_v37  ;;  %v411_v52 = vand.u32 4294901760, %v280_v35  ;;  %v415_v34 = vand.u32 4294901760, %v282_v24  ;;  %v417_v5 = vand.u32 4294901760, %v285_v63 }
  0x95   : > { %5354 = vst [vmem:[#allocation67_spill] sm:$0xff] %v4076_v55  ;;  %5356 = vst [vmem:[#allocation69_spill] sm:$0xff] %v4083_v12  ;;  %2768 = vmatprep.subr.bf16.mxu1 %v4076_v55  ;;  %v4092_v9 = vsub.f32 %v3930_v39, %v5357_v57  ;;  %v3019_v25 = vpack.c.bf16 %v5164_v23, %v5165_v33  ;;  %v284_v55 = vld [vmem:[%s3660_s26 + $0x180] sm:$0xff]  ;;  %v4104_v26 = vsub.f32 %v3940_v15, %v5360_v2  ;;  %v286_v39 = vld [vmem:[%s3660_s26 + $0x190] sm:$0xff] }
  0x96   : > { %3018 = vmatpush1.bf16.msra.mxu0 %v3017_v11  ;;  %v4098_v48 = vsub.f32 %v280_v35, %v411_v52  ;;  %v421_v11 = vand.u32 4294901760, %v287_v10  ;;  %v4106_v56 = vpack.c.bf16 %v415_v34, %v411_v52  ;;  %v4108_v62 = vsub.f32 %v282_v24, %v415_v34  ;;  %v291_v24 = vld [vmem:[%s3660_s26 + $0x1b8] sm:$0xff] }
  0x97   : > { %5358 = vst [vmem:[#allocation70_spill] sm:$0xff] %v4092_v9  ;;  %5361 = vst [vmem:[#allocation72_spill] sm:$0xff] %v4104_v26  ;;  %v5364_v54 = vand.u32 4294901760, %v3976_v50  ;;  %3020 = vmatprep.subr.bf16.mxu0 %v3019_v25  ;;  %v5366_v23 = vand.u32 4294901760, %v4060_v0  ;;  %v5367_v33 = vand.u32 4294901760, %v4066_v8  ;;  %v4124_v52 = vsub.f32 %v285_v63, %v417_v5 }
  0x98   : > { %5359 = vst [vmem:[#allocation71_spill] sm:$0xff] %v4098_v48  ;;  %5362 = vst [vmem:[#allocation73_spill] sm:$0xff] %v4106_v56  ;;  %v4122_v15 = vpack.c.bf16 %v421_v11, %v417_v5  ;;  %v5370_v34 = vand.u32 4294901760, %v3982_v53  ;;  %2770 = vmatpush1.bf16.msra.mxu1 %v4106_v56  ;;  %v5181_v25 = vand.u32 4294901760, %v4083_v12  ;;  %v425_v5 = vand.u32 4294901760, %v289_v1  ;;  %v288_v56 = vld [vmem:[%s3660_s26 + $0x1a0] sm:$0xff] }
  0x99   : > { %5363 = vst [vmem:[#allocation74_spill] sm:$0xff] %v4108_v62  ;;  %v4116_v35 = vsub.f32 %v3976_v50, %v5364_v54  ;;  %v3021_v2 = vpack.c.bf16 %v5367_v33, %v5366_v23  ;;  %5369 = vst [vmem:[#allocation77_spill] sm:$0xff] %v4124_v52  ;;  %v4133_v54 = vsub.f32 %v287_v10, %v421_v11  ;;  %v419_v50 = vand.u32 4294901760, %v284_v55 }
  0x9a   : > { %5368 = vst [vmem:[#allocation76_spill] sm:$0xff] %v4122_v15  ;;  %v4130_v57 = vsub.f32 %v3982_v53, %v5370_v34  ;;  %2772 = vmatprep.subr.bf16.mxu1 %v4122_v15  ;;  %v423_v23 = vand.u32 4294901760, %v286_v39  ;;  %v5373_v53 = vand.u32 4294901760, %v4078_v37  ;;  %v5194_v63 = vand.u32 4294901760, %v4124_v52  ;;  %v293_v34 = vld [vmem:[%s3660_s26 + $0x1c8] sm:$0xff] }
  0x9b   : > { %5365 = vst [vmem:[#allocation75_spill] sm:$0xff] %v4116_v35  ;;  %5372 = vst [vmem:[#allocation79_spill] sm:$0xff] %v4133_v54  ;;  %3022 = vmatpush1.bf16.msra.mxu0 %v3021_v2  ;;  %v4144_v11 = vsub.f32 %v284_v55, %v419_v50  ;;  %v429_v2 = vand.u32 4294901760, %v291_v24  ;;  %v5377_v12 = vand.u32 4294901760, %v4098_v48  ;;  %v4162_v9 = vsub.f32 %v289_v1, %v425_v5  ;;  %v297_v52 = vld [vmem:[%s3660_s26 + $0x1e8] sm:$0xff]  ;;  %v296_v35 = vld [vmem:[%s3660_s26 + $0x1e0] sm:$0xff] }
  0x9c   : > { %5371 = vst [vmem:[#allocation78_spill] sm:$0xff] %v4130_v57  ;;  %v3023_v10 = vpack.c.bf16 %v5181_v25, %v5373_v53  ;;  %v4148_v32 = vpack.c.bf16 %v423_v23, %v419_v50  ;;  %v4150_v33 = vsub.f32 %v286_v39, %v423_v23  ;;  %v5378_v53 = vand.u32 4294901760, %v4108_v62  ;;  %v295_v50 = vld [vmem:[%s3660_s26 + $0x1d8] sm:$0xff] }
  0x9d   : > { %5374 = vst [vmem:[#allocation80_spill] sm:$0xff] %v4144_v11  ;;  %v4160_v25 = vpack.c.bf16 %v429_v2, %v425_v5  ;;  %5380 = vst [vmem:[#allocation84_spill] sm:$0xff] %v4162_v9  ;;  %v4167_v23 = vsub.f32 %v291_v24, %v429_v2  ;;  %v5193_v37 = vand.u32 4294901760, %v4133_v54  ;;  %v5382_v39 = vand.u32 4294901760, %v4014_v51 }
  0x9e   : > { %5375 = vst [vmem:[#allocation81_spill] sm:$0xff] %v4148_v32  ;;  %5376 = vst [vmem:[#allocation82_spill] sm:$0xff] %v4150_v33  ;;  %3024 = vmatprep.subr.bf16.mxu0 %v3023_v10  ;;  %v3025_v55 = vpack.c.bf16 %v5378_v53, %v5377_v12  ;;  %2774 = vmatpush1.bf16.msra.mxu1 %v4148_v32  ;;  %v427_v10 = vand.u32 4294901760, %v288_v56  ;;  %v431_v12 = vand.u32 4294901760, %v290_v27  ;;  %v433_v53 = vand.u32 4294901760, %v293_v34 }
  0x9f   : > { %5379 = vst [vmem:[#allocation83_spill] sm:$0xff] %v4160_v25  ;;  %5381 = vst [vmem:[#allocation85_spill] sm:$0xff] %v4167_v23  ;;  %2776 = vmatprep.subr.bf16.mxu1 %v4160_v25  ;;  %v4176_v15 = vsub.f32 %v4014_v51, %v5382_v39  ;;  %v3027_v24 = vpack.c.bf16 %v5193_v37, %v5194_v63  ;;  %v292_v25 = vld [vmem:[%s3660_s26 + $0x1c0] sm:$0xff]  ;;  %v5383_v1 = vand.u32 4294901760, %v4024_v17  ;;  %v294_v51 = vld [vmem:[%s3660_s26 + $0x1d0] sm:$0xff]  ;;  %v5385_v54 = vand.u32 4294901760, %v4060_v0 }
  0xa0   : > { %3026 = vmatpush1.bf16.msra.mxu0 %v3025_v55  ;;  %v4182_v2 = vsub.f32 %v288_v56, %v427_v10  ;;  %v437_v55 = vand.u32 4294901760, %v295_v50  ;;  %v4190_v32 = vpack.c.bf16 %v431_v12, %v427_v10  ;;  %v4192_v57 = vsub.f32 %v290_v27, %v431_v12  ;;  %v299_v27 = vld [vmem:[%s3660_s26 + $0x1f8] sm:$0xff] }
  0xa1   : > { %v4188_v5 = vsub.f32 %v4024_v17, %v5383_v1  ;;  %v4200_v56 = vsub.f32 %v4060_v0, %v5385_v54  ;;  %3028 = vmatprep.subr.bf16.mxu0 %v3027_v24  ;;  %v5386_v37 = vand.u32 4294901760, %v4144_v11  ;;  %v5387_v63 = vand.u32 4294901760, %v4150_v33 }
  0xa2   : > { %5384 = vst [vmem:[#allocation86_spill] sm:$0xff] %v4190_v32  ;;  %v4206_v17 = vpack.c.bf16 %v437_v55, %v433_v53  ;;  %v4208_v10 = vsub.f32 %v293_v34, %v433_v53  ;;  %v5390_v12 = vand.u32 4294901760, %v4066_v8  ;;  %2778 = vmatpush1.bf16.msra.mxu1 %v4190_v32  ;;  %v4217_v54 = vsub.f32 %v295_v50, %v437_v55 }
  0xa3   : > { %v3029_v1 = vpack.c.bf16 %v5387_v63, %v5386_v37  ;;  %v5207_v24 = vand.u32 4294901760, %v4167_v23  ;;  %v435_v0 = vand.u32 4294901760, %v292_v25  ;;  %v439_v37 = vand.u32 4294901760, %v294_v51  ;;  %v298_v63 = vld [vmem:[%s3660_s26 + $0x1f0] sm:$0xff] }
  0xa4   : > { %5388 = vst [vmem:[#allocation87_spill] sm:$0xff] %v4206_v17  ;;  %5389 = vst [vmem:[#allocation88_spill] sm:$0xff] %v4208_v10  ;;  %v4214_v39 = vsub.f32 %v4066_v8, %v5390_v12  ;;  %2780 = vmatprep.subr.bf16.mxu1 %v4206_v17  ;;  %v441_v53 = vand.u32 4294901760, %v297_v52  ;;  %v5391_v8 = vand.u32 4294901760, %v4162_v9  ;;  %v445_v32 = vand.u32 4294901760, %v299_v27 }
  0xa5   : > { %3030 = vmatpush1.bf16.msra.mxu0 %v3029_v1  ;;  %v4228_v55 = vsub.f32 %v292_v25, %v435_v0  ;;  %v4232_v17 = vpack.c.bf16 %v439_v37, %v435_v0  ;;  %v4234_v26 = vsub.f32 %v294_v51, %v439_v37  ;;  %v5217_v34 = vand.u32 4294901760, %v4208_v10 }
  0xa6   : > { %v3031_v50 = vpack.c.bf16 %v5207_v24, %v5391_v8  ;;  %v5395_v23 = vand.u32 4294901760, %v4182_v2  ;;  %v5396_v8 = vand.u32 4294901760, %v4192_v57  ;;  %v4243_v24 = vpack.c.bf16 %v445_v32, %v441_v53 }
  0xa7   : > { %5392 = vst [vmem:[#allocation89_spill] sm:$0xff] %v4228_v55  ;;  %5393 = vst [vmem:[#allocation90_spill] sm:$0xff] %v4232_v17  ;;  %v4245_v9 = vsub.f32 %v297_v52, %v441_v53  ;;  %2782 = vmatpush1.bf16.msra.mxu1 %v4232_v17  ;;  %v4249_v51 = vsub.f32 %v299_v27, %v445_v32  ;;  %v5216_v37 = vand.u32 4294901760, %v4217_v54  ;;  %v443_v1 = vand.u32 4294901760, %v296_v35  ;;  %v224_v52 = vld [vmem:[#allocation2] sm:$0xff] }
  0xa8   : > { %5394 = vst [vmem:[#allocation91_spill] sm:$0xff] %v4234_v26  ;;  %3032 = vmatprep.subr.bf16.mxu0 %v3031_v50  ;;  %v3033_v25 = vpack.c.bf16 %v5396_v8, %v5395_v23  ;;  %5397 = vst [vmem:[#allocation92_spill] sm:$0xff] %v4243_v24  ;;  %2784 = vmatprep.subr.bf16.mxu1 %v4243_v24  ;;  %v447_v50 = vand.u32 4294901760, %v298_v63  ;;  %v4255_v8 = vand.u32 4294901760, %v225_v6  ;;  %v5401_v53 = vand.u32 4294901760, %v3768_v13 }
  0xa9   : > { %5398 = vst [vmem:[#allocation93_spill] sm:$0xff] %v4245_v9  ;;  %5399 = vst [vmem:[#allocation94_spill] sm:$0xff] %v4249_v51  ;;  %v3035_v32 = vpack.c.bf16 %v5216_v37, %v5217_v34  ;;  %v4261_v27 = vsub.f32 %v296_v35, %v443_v1  ;;  %v5220_v24 = vand.u32 4294901760, %v4245_v9  ;;  %v5403_v12 = vand.u32 4294901760, %v4098_v48 }
  0xaa   : > { %3034 = vmatpush1.bf16.msra.mxu0 %v3033_v25  ;;  %v5402_v25 = vand.u32 4294901760, %v3779_v28  ;;  %v5404_v17 = vand.u32 4294901760, %v4108_v62  ;;  %v4278_v37 = vpack.c.bf16 %v447_v50, %v443_v1  ;;  %v4280_v35 = vsub.f32 %v298_v63, %v447_v50  ;;  %1598 = vmatprep.mubr.f32.mxu0 %v4255_v8 }
  0xab   : > { %5400 = vst [vmem:[#allocation95_spill] sm:$0xff] %v4261_v27  ;;  %v4271_v23 = vsub.f32 %v4098_v48, %v5403_v12  ;;  %3036 = vmatprep.subr.bf16.mxu0 %v3035_v32  ;;  %v5406_v13 = vand.u32 4294901760, %v4228_v55  ;;  %v5407_v28 = vand.u32 4294901760, %v4234_v26  ;;  %v4288_v12 = vsub.f32 %v225_v6, %v4255_v8 }
  0xac   : > { %v2787_v0 = vpack.c.bf16 %v5402_v25, %v5401_v53  ;;  %v4276_v10 = vsub.f32 %v4108_v62, %v5404_v17  ;;  %5405 = vst [vmem:[#allocation96_spill] sm:$0xff] %v4280_v35  ;;  %v4291_v34 = vand.u32 4294901760, %v224_v52  ;;  %v5408_v17 = vand.u32 4294901760, %v4144_v11  ;;  %2786 = vmatpush1.bf16.msra.mxu1 %v4278_v37 }
  0xad   : > { %v3037_v53 = vpack.c.bf16 %v5407_v28, %v5406_v13  ;;  %v5409_v1 = vand.u32 4294901760, %v4150_v33  ;;  %v5410_v32 = vand.u32 4294901760, %v3792_v40  ;;  %v5411_v6 = vand.u32 4294901760, %v3795_v41 }
  0xae   : > { %v4296_v63 = vsub.f32 %v4144_v11, %v5408_v17  ;;  %v5223_v25 = vand.u32 4294901760, %v4288_v12  ;;  %2788 = vmatprep.subr.bf16.mxu1 %v2787_v0  ;;  %v5412_v17 = vand.u32 4294901760, %v4249_v51  ;;  %v5414_v41 = vand.u32 4294901760, %v3687_v22 }
  0xaf   : > { %v4301_v50 = vsub.f32 %v4150_v33, %v5409_v1  ;;  %v2789_v13 = vpack.c.bf16 %v5411_v6, %v5410_v32  ;;  %3038 = vmatpush1.bf16.msra.mxu0 %v3037_v53  ;;  %v4315_v1 = vsub.f32 %v224_v52, %v4291_v34  ;;  %v5224_v33 = vand.u32 4294901760, %v4280_v35 }
  0xb0   : > { %v3039_v11 = vpack.c.bf16 %v5412_v17, %v5220_v24  ;;  %v541_v32 = vsub.f32 %v3687_v22, %v5414_v41  ;;  %v5415_v53 = vand.u32 4294901760, %v3697_v30  ;;  %v5416_v6 = vand.u32 4294901760, %v3840_v61 }
  0xb1   : > { %5413 = vst [vmem:[#allocation97_spill] sm:$0xff] %v4315_v1  ;;  %v5417_v28 = vand.u32 4294901760, %v3852_v44  ;;  %v452_v24 = vsub.f32 %v4288_v12, %v5223_v25  ;;  %v5225_v40 = vand.u32 4294901760, %v4315_v1  ;;  %v5418_v41 = vand.u32 4294901760, %v4261_v27 }
  0xb2   : > { %v553_v0 = vsub.f32 %v3697_v30, %v5415_v53  ;;  %3040 = vmatprep.subr.bf16.mxu0 %v3039_v11  ;;  %v542_v61 = vand.u32 4294901760, %v541_v32  ;;  %v5419_v44 = vand.u32 4294901760, %v3717_v42  ;;  %v5420_v25 = vand.u32 4294901760, %v3719_v43 }
  0xb3   : > { %v2793_v17 = vpack.c.bf16 %v5417_v28, %v5416_v6  ;;  %v3041_v62 = vpack.c.bf16 %v5224_v33, %v5418_v41  ;;  %v453_v52 = vand.u32 4294901760, %v452_v24  ;;  %v458_v11 = vsub.f32 %v4315_v1, %v5225_v40 }
  0xb4   : > { %v554_v48 = vand.u32 4294901760, %v553_v0  ;;  %v565_v28 = vsub.f32 %v3717_v42, %v5419_v44  ;;  %v577_v41 = vsub.f32 %v3719_v43, %v5420_v25  ;;  %v5421_v0 = vand.u32 4294901760, %v3864_v58 }
  0xb5   : > { %3042 = vmatpush1.bf16.msra.mxu0 %v3041_v62  ;;  %v5422_v44 = vand.u32 4294901760, %v3878_v4  ;;  %v5423_v24 = vand.u32 4294901760, %v3744_v60  ;;  %454 = vmatprep.mubr.f32.mxu1 %v453_v52  ;;  %v459_v40 = vand.u32 4294901760, %v458_v11  ;;  %v5424_v1 = vand.u32 4294901760, %v3752_v3 }
  0xb6   : > { %v2791_v33 = vpack.c.bf16 %v554_v48, %v542_v61  ;;  %3044 = vmatprep.subr.bf16.mxu0 %v3674_v14  ;;  %v566_v32 = vand.u32 4294901760, %v565_v28  ;;  %v578_v62 = vand.u32 4294901760, %v577_v41  ;;  %v5425_v48 = vand.u32 4294901760, %v3924_v49  ;;  %v5454_v14 = vld [vmem:[#allocation75_spill] sm:$0xff] }
  0xb7   : > { %v2797_v53 = vpack.c.bf16 %v5422_v44, %v5421_v0  ;;  %v589_v6 = vsub.f32 %v3744_v60, %v5423_v24  ;;  %v601_v25 = vsub.f32 %v3752_v3, %v5424_v1  ;;  %v5426_v61 = vand.u32 4294901760, %v3936_v38  ;;  %460 = vmatmul.mubr.f32.vlgmr.msra.gmra.mrb[0].mxu1 %v459_v40 }
  0xb8   : > { %1600 = vmatmul.mubr.f32.vlgmr.msra.gmra.mrb[0].mxu0 %v4291_v34  ;;  %v5427_v4 = vand.u32 4294901760, %v3787_v31  ;;  %v5428_v52 = vand.u32 4294901760, %v3803_v47  ;;  %v5429_v41 = vand.u32 4294901760, %v3948_v36  ;;  %v5430_v1 = vand.u32 4294901760, %v3962_v59  ;;  %2790 = vmatpush1.bf16.msra.mxu1 %v2789_v13 }
  0xb9   : > { %v4364_v28 = vpack.c.bf16 %v5426_v61, %v5425_v48  ;;  %v590_v58 = vand.u32 4294901760, %v589_v6  ;;  %3046 = vmatpush1.bf16.msra.mxu0 %v3682_v20  ;;  %v2795_v38 = vpack.c.bf16 %v578_v62, %v566_v32  ;;  %v602_v44 = vand.u32 4294901760, %v601_v25  ;;  %2792 = vmatprep.subr.bf16.mxu1 %v2791_v33  ;;  %v5442_v33 = vld [vmem:[#allocation18_spill] sm:$0xff] }
  0xba   : > { %v613_v0 = vsub.f32 %v3787_v31, %v5427_v4  ;;  %v625_v11 = vsub.f32 %v3803_v47, %v5428_v52  ;;  %v4377_v49 = vpack.c.bf16 %v5430_v1, %v5429_v41  ;;  %v5431_v6 = vand.u32 4294901760, %v3826_v29  ;;  %3048 = vmatprep.subr.bf16.mxu0 %v3684_v21 }
  0xbb   : > { %v5432_v48 = vand.u32 4294901760, %v3831_v46  ;;  %v5433_v4 = vand.u32 4294901760, %v4008_v18  ;;  %v5434_v40 = vand.u32 4294901760, %v4020_v45  ;;  %v5435_v32 = vand.u32 4294901760, %v3872_v19 }
  0xbc   : > { %v637_v24 = vsub.f32 %v3826_v29, %v5431_v6  ;;  %v614_v36 = vand.u32 4294901760, %v613_v0  ;;  %v626_v59 = vand.u32 4294901760, %v625_v11  ;;  %v2799_v25 = vpack.c.bf16 %v602_v44, %v590_v58  ;;  %2794 = vmatpush1.bf16.msra.mxu1 %v2793_v17 }
  0xbd   : > { %v649_v61 = vsub.f32 %v3831_v46, %v5432_v48  ;;  %v4391_v52 = vpack.c.bf16 %v5434_v40, %v5433_v4  ;;  %v661_v62 = vsub.f32 %v3872_v19, %v5435_v32  ;;  %v5436_v13 = vand.u32 4294901760, %v3881_v7  ;;  %v5438_v48 = vld [vmem:[#allocation62_spill] sm:$0xff]  ;;  %v5440_v40 = vld [vmem:[#allocation43_spill] sm:$0xff]  ;;  %3050 = vmatpush1.bf16.msra.mxu0 %v5442_v33  ;;  %2796 = vmatprep.subr.bf16.mxu1 %v2795_v38  ;;  %v5464_v38 = vld [vmem:[#allocation61_spill] sm:$0xff] }
  0xbe   : > { %v638_v41 = vand.u32 4294901760, %v637_v24  ;;  %v2803_v0 = vpack.c.bf16 %v626_v59, %v614_v36  ;;  %v5437_v18 = vand.u32 4294901760, %v4032_v16  ;;  %v5439_v45 = vand.u32 4294901760, %v5438_v48  ;;  %v5443_v24 = vld [vmem:[#allocation44_spill] sm:$0xff]  ;;  %v5445_v59 = vld [vmem:[#allocation70_spill] sm:$0xff] }
  0xbf   : > { %v650_v1 = vand.u32 4294901760, %v649_v61  ;;  %v673_v6 = vsub.f32 %v3881_v7, %v5436_v13  ;;  %v662_v11 = vand.u32 4294901760, %v661_v62  ;;  %v5441_v21 = vand.u32 4294901760, %v5440_v40  ;;  %v5447_v16 = vld [vmem:[#allocation72_spill] sm:$0xff] }
  0xc0   : > { %v4403_v4 = vpack.c.bf16 %v5439_v45, %v5437_v18  ;;  %v5444_v61 = vand.u32 4294901760, %v5443_v24  ;;  %v5446_v62 = vand.u32 4294901760, %v5445_v59  ;;  %v5448_v13 = vand.u32 4294901760, %v5447_v16  ;;  %v5449_v18 = vld [vmem:[#allocation21_spill] sm:$0xff]  ;;  %v5458_v16 = vld [vmem:[#allocation55_spill] sm:$0xff]  ;;  %2798 = vmatpush1.bf16.msra.mxu1 %v2797_v53 }
  0xc1   : > { %v685_v32 = vsub.f32 %v5440_v40, %v5441_v21  ;;  %v4409_v58 = vpack.c.bf16 %v650_v1, %v638_v41  ;;  %v674_v44 = vand.u32 4294901760, %v673_v6  ;;  %3052 = vmatprep.subr.bf16.mxu0 %v5449_v18  ;;  %v5450_v21 = vld [vmem:[#allocation49_spill] sm:$0xff]  ;;  %v5452_v1 = vld [vmem:[#allocation50_spill] sm:$0xff]  ;;  %v5460_v18 = vld [vmem:[#allocation56_spill] sm:$0xff]  ;;  %2800 = vmatprep.subr.bf16.mxu1 %v2799_v25 }
  0xc2   : > { %v697_v36 = vsub.f32 %v5443_v24, %v5444_v61  ;;  %v4418_v48 = vpack.c.bf16 %v5448_v13, %v5446_v62  ;;  %v5451_v20 = vand.u32 4294901760, %v5450_v21  ;;  %v5453_v6 = vand.u32 4294901760, %v5452_v1  ;;  %v5456_v24 = vld [vmem:[#allocation78_spill] sm:$0xff] }
  0xc3   : > { %v686_v45 = vand.u32 4294901760, %v685_v32  ;;  %v5455_v61 = vand.u32 4294901760, %v5454_v14  ;;  %v5457_v59 = vand.u32 4294901760, %v5456_v24  ;;  %v4433_v62 = vpack.c.bf16 %v674_v44, %v662_v11 }
  0xc4   : > { %v709_v41 = vsub.f32 %v5450_v21, %v5451_v20  ;;  %v721_v33 = vsub.f32 %v5452_v1, %v5453_v6  ;;  %v698_v17 = vand.u32 4294901760, %v697_v36  ;;  %v5459_v32 = vand.u32 4294901760, %v5458_v16  ;;  %v5466_v36 = vld [vmem:[#allocation22_spill] sm:$0xff]  ;;  %v5467_v1 = vld [vmem:[#allocation63_spill] sm:$0xff]  ;;  %2802 = vmatpush1.bf16.msra.mxu1 %v4364_v28 }
  0xc5   : > { %v4431_v40 = vpack.c.bf16 %v5457_v59, %v5455_v61  ;;  %v5461_v20 = vand.u32 4294901760, %v5460_v18  ;;  %v5462_v14 = vand.u32 4294901760, %v4176_v15  ;;  %v5463_v24 = vand.u32 4294901760, %v4188_v5  ;;  %3054 = vmatpush1.bf16.msra.mxu0 %v5466_v36  ;;  %v5469_v15 = vld [vmem:[#allocation25_spill] sm:$0xff]  ;;  %2804 = vmatprep.subr.bf16.mxu1 %v2803_v0 }
  0xc6   : > { %v733_v13 = vsub.f32 %v5458_v16, %v5459_v32  ;;  %v710_v7 = vand.u32 4294901760, %v709_v41  ;;  %v722_v6 = vand.u32 4294901760, %v721_v33  ;;  %v5465_v11 = vand.u32 4294901760, %v5464_v38  ;;  %3056 = vmatprep.subr.bf16.mxu0 %v5469_v15  ;;  %v234_v0 = vld [vmem:[#allocation2 + $0x50] sm:$0xff] }
  0xc7   : > { %v745_v21 = vsub.f32 %v5460_v18, %v5461_v20  ;;  %v4445_v61 = vpack.c.bf16 %v5463_v24, %v5462_v14  ;;  %v4451_v59 = vpack.c.bf16 %v698_v17, %v686_v45  ;;  %v5468_v20 = vand.u32 4294901760, %v5467_v1  ;;  %v5472_v45 = vld [vmem:[#allocation68_spill] sm:$0xff] }
  0xc8   : > { %v757_v44 = vsub.f32 %v5464_v38, %v5465_v11  ;;  %v734_v32 = vand.u32 4294901760, %v733_v13  ;;  %v4457_v5 = vpack.c.bf16 %v722_v6, %v710_v7  ;;  %v5470_v14 = vand.u32 4294901760, %v4200_v56  ;;  %v228_v13 = vld [vmem:[#allocation2 + $0x20] sm:$0xff]  ;;  %2806 = vmatpush1.bf16.msra.mxu1 %v4377_v49 }
  0xc9   : > { %v746_v16 = vand.u32 4294901760, %v745_v21  ;;  %v769_v33 = vsub.f32 %v5467_v1, %v5468_v20  ;;  %v5471_v24 = vand.u32 4294901760, %v4214_v39  ;;  %v5473_v17 = vand.u32 4294901760, %v5472_v45  ;;  %v5474_v20 = vld [vmem:[#allocation69_spill] sm:$0xff]  ;;  %2808 = vmatprep.subr.bf16.mxu1 %v4409_v58  ;;  %v233_v58 = vld [vmem:[#allocation2 + $0x48] sm:$0xff] }
  0xca   : > { %v758_v41 = vand.u32 4294901760, %v757_v44  ;;  %v5475_v15 = vand.u32 4294901760, %v5474_v20  ;;  %v5476_v6 = vand.u32 4294901760, %v4271_v23  ;;  %v5477_v56 = vand.u32 4294901760, %v4276_v10  ;;  %v227_v44 = vld [vmem:[#allocation2 + $0x18] sm:$0xff] }
  0xcb   : > { %v4463_v11 = vpack.c.bf16 %v5471_v24, %v5470_v14  ;;  %v781_v21 = vsub.f32 %v5472_v45, %v5473_v17  ;;  %v4468_v36 = vpack.c.bf16 %v746_v16, %v734_v32  ;;  %v770_v53 = vand.u32 4294901760, %v769_v33  ;;  %v5480_v16 = vld [vmem:[#allocation27_spill] sm:$0xff]  ;;  %v231_v23 = vld [vmem:[#allocation2 + $0x38] sm:$0xff] }
  0xcc   : > { %v793_v7 = vsub.f32 %v5474_v20, %v5475_v15  ;;  %v4477_v39 = vpack.c.bf16 %v5477_v56, %v5476_v6  ;;  %v5478_v24 = vand.u32 4294901760, %v4296_v63  ;;  %v5479_v17 = vand.u32 4294901760, %v4301_v50  ;;  %3058 = vmatpush1.bf16.msra.mxu0 %v5480_v16  ;;  %v230_v50 = vld [vmem:[#allocation2 + $0x30] sm:$0xff]  ;;  %2810 = vmatpush1.bf16.msra.mxu1 %v4391_v52 }
  0xcd   : > { %v782_v14 = vand.u32 4294901760, %v781_v21  ;;  %v4486_v32 = vpack.c.bf16 %v770_v53, %v758_v41  ;;  %v4488_v15 = vand.u32 4294901760, %v228_v13  ;;  %v5481_v10 = vand.u32 4294901760, %v4261_v27  ;;  %v5482_v21 = vld [vmem:[#allocation29_spill] sm:$0xff]  ;;  %2812 = vmatprep.subr.bf16.mxu1 %v4433_v62 }
  0xce   : > { %v4483_v25 = vpack.c.bf16 %v5479_v17, %v5478_v24  ;;  %v794_v33 = vand.u32 4294901760, %v793_v7  ;;  %3060 = vmatprep.subr.bf16.mxu0 %v5482_v21  ;;  %v4495_v63 = vand.u32 4294901760, %v227_v44  ;;  %v5483_v56 = vand.u32 4294901760, %v4280_v35  ;;  %v5486_v17 = vld [vmem:[#allocation31_spill] sm:$0xff] }
  0xcf   : > { %v883_v6 = vsub.f32 %v4261_v27, %v5481_v10  ;;  %v4503_v7 = vsub.f32 %v228_v13, %v4488_v15  ;;  %1606 = vmatprep.mubr.f32.mxu0 %v4488_v15  ;;  %v4509_v28 = vand.u32 4294901760, %v231_v23  ;;  %v5487_v13 = vld [vmem:[#allocation33_spill] sm:$0xff] }
  0xd0   : > { %v895_v41 = vsub.f32 %v4280_v35, %v5483_v56  ;;  %v4500_v53 = vpack.c.bf16 %v794_v33, %v782_v14  ;;  %v4507_v24 = vsub.f32 %v227_v44, %v4495_v63  ;;  %1608 = vmatmul.mubr.f32.gmra.mrb[2].mxu0 %v4495_v63  ;;  %v4514_v56 = vand.u32 4294901760, %v230_v50  ;;  %2814 = vmatpush1.bf16.msra.mxu1 %v4403_v4  ;;  %v306_v27 = vld [vmem:[%s3660_s26 + $0x230] sm:$0xff] }
  0xd1   : > { %5484 = vst [vmem:[#allocation62_spill] sm:$0xff] %v4503_v7  ;;  %3062 = vmatpush1.bf16.msra.mxu0 %v5486_v17  ;;  %v5237_v10 = vand.u32 4294901760, %v4503_v7  ;;  %v4520_v44 = vsub.f32 %v231_v23, %v4509_v28  ;;  %v884_v33 = vand.u32 4294901760, %v883_v6  ;;  %1614 = vmatprep.mubr.f32.mxu0 %v4509_v28  ;;  %v5490_v6 = vld [vmem:[#allocation35_spill] sm:$0xff] }
  0xd2   : > { %5485 = vst [vmem:[#allocation70_spill] sm:$0xff] %v4507_v24  ;;  %3064 = vmatprep.subr.bf16.mxu0 %v5487_v13  ;;  %v5240_v14 = vand.u32 4294901760, %v4507_v24  ;;  %v896_v21 = vand.u32 4294901760, %v895_v41  ;;  %v4527_v16 = vsub.f32 %v230_v50, %v4514_v56  ;;  %v4534_v13 = vand.u32 4294901760, %v234_v0  ;;  %v5491_v50 = vld [vmem:[#allocation37_spill] sm:$0xff]  ;;  %2816 = vmatprep.subr.bf16.mxu1 %v4451_v59 }
  0xd3   : > { %5488 = vst [vmem:[#allocation72_spill] sm:$0xff] %v4520_v44  ;;  %v468_v17 = vsub.f32 %v4503_v7, %v5237_v10  ;;  %v5243_v23 = vand.u32 4294901760, %v4520_v44 }
  0xd4   : > { %5489 = vst [vmem:[#allocation75_spill] sm:$0xff] %v4527_v16  ;;  %v474_v49 = vsub.f32 %v4507_v24, %v5240_v14  ;;  %1616 = vmatmul.mubr.f32.gmra.mrb[4].mxu0 %v4514_v56  ;;  %v5246_v10 = vand.u32 4294901760, %v4527_v16  ;;  %v4545_v24 = vsub.f32 %v234_v0, %v4534_v13  ;;  %v4553_v52 = vpack.c.bf16 %v896_v21, %v884_v33  ;;  %v5496_v33 = vld [vmem:[#allocation46_spill] sm:$0xff] }
  0xd5   : > { %3066 = vmatpush1.bf16.msra.mxu0 %v5490_v6  ;;  %v469_v41 = vand.u32 4294901760, %v468_v17  ;;  %v484_v14 = vsub.f32 %v4520_v44, %v5243_v23  ;;  %v4551_v6 = vand.u32 4294901760, %v233_v58  ;;  %1622 = vmatprep.mubr.f32.mxu0 %v4534_v13  ;;  %v5493_v23 = vld [vmem:[#allocation40_spill] sm:$0xff] }
  0xd6   : > { %3068 = vmatprep.subr.bf16.mxu0 %v5491_v50  ;;  %v475_v7 = vand.u32 4294901760, %v474_v49  ;;  %5492 = vst [vmem:[#allocation78_spill] sm:$0xff] %v4545_v24  ;;  %v490_v17 = vsub.f32 %v4527_v16, %v5246_v10  ;;  %v5245_v50 = vand.u32 4294901760, %v4545_v24  ;;  %2818 = vmatpush1.bf16.msra.mxu1 %v4418_v48  ;;  %v5502_v48 = vld [vmem:[#allocation79_spill] sm:$0xff]  ;;  %v5523_v16 = vld [vmem:[#allocation81_spill] sm:$0xff] }
  0xd7   : > { %470 = vmatprep.mubr.f32.mxu1 %v469_v41  ;;  %v485_v49 = vand.u32 4294901760, %v484_v14  ;;  %v4559_v62 = vsub.f32 %v233_v58, %v4551_v6  ;;  %v5495_v41 = vld [vmem:[#allocation42_spill] sm:$0xff]  ;;  %v5497_v58 = vld [vmem:[#allocation48_spill] sm:$0xff]  ;;  %2820 = vmatprep.subr.bf16.mxu1 %v4457_v5 }
  0xd8   : > { %476 = vmatmul.mubr.f32.gmra.mrb[2].mxu1 %v475_v7  ;;  %v491_v0 = vand.u32 4294901760, %v490_v17  ;;  %v500_v21 = vsub.f32 %v4545_v24, %v5245_v50  ;;  %1624 = vmatmul.mubr.f32.gmra.mrb[6].mxu0 %v4551_v6  ;;  %v5498_v17 = vld [vmem:[#allocation52_spill] sm:$0xff]  ;;  %v5503_v50 = vand.u32 4294901760, %v5502_v48  ;;  %v5504_v5 = vld [vmem:[#allocation58_spill] sm:$0xff] }
  0xd9   : > { %3070 = vmatpush1.bf16.msra.mxu0 %v5493_v23  ;;  %5494 = vst [vmem:[#allocation56_spill] sm:$0xff] %v4559_v62  ;;  %486 = vmatprep.mubr.f32.mxu1 %v485_v49  ;;  %v5244_v7 = vand.u32 4294901760, %v4559_v62  ;;  %v5499_v49 = vld [vmem:[#allocation54_spill] sm:$0xff] }
  0xda   : > { %3072 = vmatprep.subr.bf16.mxu0 %v5495_v41  ;;  %v501_v14 = vand.u32 4294901760, %v500_v21  ;;  %1759 = vmatprep.mubr.f32.mxu0 %v4255_v8  ;;  %v817_v10 = vsub.f32 %v5502_v48, %v5503_v50 }
  0xdb   : > { %v506_v4 = vsub.f32 %v4559_v62, %v5244_v7  ;;  %2822 = vmatpush1.bf16.msra.mxu1 %v4431_v40 }
  0xdc   : > { %492 = vmatmul.mubr.f32.gmra.mrb[4].mxu1 %v491_v0  ;;  %2824 = vmatprep.subr.bf16.mxu1 %v4468_v36  ;;  %v5500_v0 = vld [vmem:[#allocation77_spill] sm:$0xff]  ;;  %v818_v36 = vand.u32 4294901760, %v817_v10  ;;  %v5514_v10 = vld [vmem:[#allocation88_spill] sm:$0xff] }
  0xdd   : > { %3074 = vmatpush1.bf16.msra.mxu0 %v5496_v33  ;;  %502 = vmatprep.mubr.f32.mxu1 %v501_v14  ;;  %v507_v59 = vand.u32 4294901760, %v506_v4  ;;  %v5501_v21 = vand.u32 4294901760, %v5500_v0  ;;  %v5505_v14 = vld [vmem:[#allocation60_spill] sm:$0xff] }
  0xde   : > { %3076 = vmatprep.subr.bf16.mxu0 %v5497_v58  ;;  %v5506_v4 = vld [vmem:[#allocation84_spill] sm:$0xff]  ;;  %v5512_v58 = vld [vmem:[#allocation65_spill] sm:$0xff] }
  0xdf   : > { %v805_v7 = vsub.f32 %v5500_v0, %v5501_v21  ;;  %2826 = vmatpush1.bf16.msra.mxu1 %v4445_v61  ;;  %v5511_v61 = vand.u32 4294901760, %v4192_v57 }
  0xe0   : > { %508 = vmatmul.mubr.f32.gmra.mrb[6].mxu1 %v507_v59  ;;  %2828 = vmatprep.subr.bf16.mxu1 %v4486_v32  ;;  %v5507_v59 = vand.u32 4294901760, %v5506_v4  ;;  %v5513_v32 = vld [vmem:[#allocation67_spill] sm:$0xff] }
  0xe1   : > { %3078 = vmatpush1.bf16.msra.mxu0 %v5498_v17  ;;  %899 = vmatprep.mubr.f32.mxu1 %v4255_v8  ;;  %v806_v40 = vand.u32 4294901760, %v805_v7  ;;  %v5510_v8 = vand.u32 4294901760, %v4182_v2  ;;  %v5515_v7 = vand.u32 4294901760, %v5514_v10 }
  0xe2   : > { %3080 = vmatprep.subr.bf16.mxu0 %v5499_v49  ;;  %v829_v21 = vsub.f32 %v5506_v4, %v5507_v59  ;;  %v5508_v49 = vld [vmem:[#allocation85_spill] sm:$0xff] }
  0xe3   : > { %v5509_v17 = vand.u32 4294901760, %v5508_v49  ;;  %2830 = vmatpush1.bf16.msra.mxu1 %v4463_v11  ;;  %v853_v59 = vsub.f32 %v5514_v10, %v5515_v7  ;;  %v2835_v33 = vpack.c.bf16 %v818_v36, %v806_v40  ;;  %v5517_v11 = vld [vmem:[#allocation73_spill] sm:$0xff]  ;;  %v5519_v7 = vand.u32 4294901760, %v4234_v26  ;;  %v301_v36 = vld [vmem:[%s3660_s26 + $0x208] sm:$0xff] }
  0xe4   : > { %2832 = vmatprep.subr.bf16.mxu1 %v4500_v53 }
  0xe5   : > { %3082 = vmatpush1.bf16.msra.mxu0 %v5504_v5  ;;  %v841_v50 = vsub.f32 %v5508_v49, %v5509_v17  ;;  %v835_v5 = vsub.f32 %v4182_v2, %v5510_v8  ;;  %v5516_v17 = vand.u32 4294901760, %v4217_v54  ;;  %v871_v24 = vsub.f32 %v4234_v26, %v5519_v7 }
  0xe6   : > { %3084 = vmatprep.subr.bf16.mxu0 %v5505_v14  ;;  %v847_v14 = vsub.f32 %v4192_v57, %v5511_v61  ;;  %v830_v61 = vand.u32 4294901760, %v829_v21  ;;  %v854_v53 = vand.u32 4294901760, %v853_v59  ;;  %v303_v21 = vld [vmem:[%s3660_s26 + $0x218] sm:$0xff]  ;;  %v1791_v7 = vand.u32 4294901760, %v301_v36  ;;  %v5524_v59 = vld [vmem:[#allocation83_spill] sm:$0xff] }
  0xe7   : > { %v865_v8 = vsub.f32 %v4217_v54, %v5516_v17  ;;  %v842_v41 = vand.u32 4294901760, %v841_v50  ;;  %2834 = vmatpush1.bf16.msra.mxu1 %v4477_v39  ;;  %v5520_v17 = vld [vmem:[#allocation76_spill] sm:$0xff]  ;;  %v1795_v39 = vand.u32 4294901760, %v303_v21  ;;  %v1805_v26 = vand.u32 4294901760, %v306_v27 }
  0xe8   : > { %v848_v23 = vand.u32 4294901760, %v847_v14  ;;  %2836 = vmatprep.subr.bf16.mxu1 %v2835_v33  ;;  %v5521_v14 = vand.u32 4294901760, %v4245_v9 }
  0xe9   : > { %3086 = vmatpush1.bf16.msra.mxu0 %v5512_v58  ;;  %v836_v58 = vand.u32 4294901760, %v835_v5  ;;  %v866_v40 = vand.u32 4294901760, %v865_v8  ;;  %v2839_v5 = vpack.c.bf16 %v842_v41, %v830_v61 }
  0xea   : > { %3088 = vmatprep.subr.bf16.mxu0 %v5513_v32  ;;  %v5518_v32 = vand.u32 4294901760, %v4228_v55  ;;  %v877_v50 = vsub.f32 %v4245_v9, %v5521_v14  ;;  %v4634_v14 = vsub.f32 %v301_v36, %v1791_v7 }
  0xeb   : > { %2838 = vmatpush1.bf16.msra.mxu1 %v4483_v25  ;;  %v2841_v33 = vpack.c.bf16 %v848_v23, %v836_v58  ;;  %v2843_v41 = vpack.c.bf16 %v866_v40, %v854_v53  ;;  %v300_v58 = vld [vmem:[%s3660_s26 + $0x200] sm:$0xff]  ;;  %v226_v53 = vld [vmem:[#allocation2 + $0x10] sm:$0xff]  ;;  %v5528_v25 = vld [vmem:[#allocation12_spill] sm:$0xff] }
  0xec   : > { %v859_v62 = vsub.f32 %v4228_v55, %v5518_v32  ;;  %v5522_v32 = vand.u32 4294901760, %v4249_v51  ;;  %2840 = vmatprep.subr.bf16.mxu1 %v2839_v5  ;;  %v878_v8 = vand.u32 4294901760, %v877_v50  ;;  %v305_v5 = vld [vmem:[%s3660_s26 + $0x228] sm:$0xff]  ;;  %v307_v50 = vld [vmem:[%s3660_s26 + $0x238] sm:$0xff]  ;;  %v232_v55 = vld [vmem:[#allocation2 + $0x40] sm:$0xff] }
  0xed   : > { %3090 = vmatpush1.bf16.msra.mxu0 %v5517_v11  ;;  %v1803_v36 = vand.u32 4294901760, %v307_v50 }
  0xee   : > { %3092 = vmatprep.subr.bf16.mxu0 %v5520_v17  ;;  %v889_v11 = vsub.f32 %v4249_v51, %v5522_v32  ;;  %v860_v44 = vand.u32 4294901760, %v859_v62  ;;  %v872_v17 = vand.u32 4294901760, %v871_v24  ;;  %v4636_v32 = vsub.f32 %v303_v21, %v1795_v39  ;;  %v5526_v62 = vld [vmem:[#allocation87_spill] sm:$0xff]  ;;  %v5527_v24 = vld [vmem:[#allocation90_spill] sm:$0xff] }
  0xef   : > { %2842 = vmatpush1.bf16.msra.mxu1 %v2841_v33  ;;  %v1793_v33 = vand.u32 4294901760, %v300_v58  ;;  %v1799_v21 = vand.u32 4294901760, %v305_v5 }
  0xf0   : > { %v890_v61 = vand.u32 4294901760, %v889_v11  ;;  %v2845_v23 = vpack.c.bf16 %v872_v17, %v860_v44  ;;  %v302_v11 = vld [vmem:[%s3660_s26 + $0x210] sm:$0xff]  ;;  %2844 = vmatprep.subr.bf16.mxu1 %v2843_v41  ;;  %v310_v17 = vsel %vm308_vm0, %v226_v53, 0  ;;  %v5530_v41 = vld [vmem:[#allocation92_spill] sm:$0xff]  ;;  %v5532_v53 = vand.u32 4294901760, %v4636_v32 }
  0xf1   : > { %3094 = vmatpush1.bf16.msra.mxu0 %v5523_v16  ;;  %v5525_v16 = vld [vmem:[#allocation86_spill] sm:$0xff]  ;;  %v1797_v44 = vand.u32 4294901760, %v302_v11  ;;  %v4665_v9 = vsub.f32 %v300_v58, %v1793_v33  ;;  %v4681_v58 = vsub.f32 %v307_v50, %v1803_v36 }
  0xf2   : > { %3096 = vmatprep.subr.bf16.mxu0 %v5524_v59  ;;  %v2847_v40 = vpack.c.bf16 %v890_v61, %v878_v8  ;;  %v4655_v8 = vpack.c.bf16 %v1795_v39, %v1791_v7  ;;  %v229_v61 = vld [vmem:[#allocation2 + $0x28] sm:$0xff]  ;;  %v304_v59 = vld [vmem:[%s3660_s26 + $0x220] sm:$0xff]  ;;  %v5534_v39 = vld [vmem:[#allocation17_spill] sm:$0xff]  ;;  %s3387_s26 = scalar_lea.vmem %s5016_s18, 1024 }
  0xf3   : > { %2846 = vmatpush1.bf16.msra.mxu1 %v2845_v23  ;;  %v1923_v23 = vsub.f32 %v4636_v32, %v5532_v53  ;;  %v5533_v7 = vld [vmem:[#allocation16_spill] sm:$0xff]  ;;  %v313_v51 = vsel %vm308_vm0, %v229_v61, 0  ;;  %v1801_v53 = vand.u32 4294901760, %v304_v59  ;;  %v1916_v50 = vand.u32 4294901760, %v4665_v9  ;;  %p3388_p4 = scmp.ne.s32.totalorder %s5016_s18, %s3387_s26  ;;  %p3395_p13 = scmp.lt.s32.totalorder %s3393_s24, %s3387_s26 }
  0xf4   : > { %2848 = vmatprep.subr.bf16.mxu1 %v2847_v40  ;;  %v4672_v40 = vpack.c.bf16 %v1797_v44, %v1793_v33  ;;  %v2855_v33 = vpack.c.bf16 %v3697_v30, %v3687_v22  ;;  %v4698_v22 = vsub.f32 %v306_v27, %v1805_v26  ;;  %v316_v30 = vsel %vm308_vm0, %v232_v55, 0 }
  0xf5   : > { %3098 = vmatpush1.bf16.msra.mxu0 %v5525_v16  ;;  %v4705_v61 = vpack.c.bf16 %v1805_v26, %v1801_v53  ;;  %v2859_v27 = vpack.c.bf16 %v3719_v43, %v3717_v42  ;;  %v4717_v26 = vand.u32 4294901760, %v316_v30  ;;  %p3389_p6 = pnand %p3388_p4, %p3598_p10  ;;  %p3396_p0 = por %p3395_p13, %p3394_p12 }
  0xf6   : > { %3100 = vmatprep.subr.bf16.mxu0 %v5526_v62  ;;  %v5529_v62 = vld [vmem:[#allocation13_spill] sm:$0xff] }
  0xf7   : > { %v2851_v16 = vpack.c.bf16 %v5529_v62, %v5528_v25  ;;  %v4667_v25 = vand.u32 4294901760, %v310_v17  ;;  %v2853_v62 = vpack.c.bf16 %v5534_v39, %v5533_v7  ;;  %2850 = vmatpush1.bf16.msra.mxu1 %v4553_v52  ;;  %v4685_v7 = vpack.c.bf16 %v1803_v36, %v1799_v21  ;;  %v5535_v36 = vld [vmem:[#allocation19_spill] sm:$0xff]  ;;  %p3390_p8 = pneg %p3389_p6 }
  0xf9   : > { %3102 = vmatpush1.bf16.msra.mxu0 %v5527_v24  ;;  %v5531_v24 = vand.u32 4294901760, %v4634_v14  ;;  %2852 = vmatprep.subr.bf16.mxu1 %v2851_v16  ;;  %v4689_v52 = vsub.f32 %v310_v17, %v4667_v25  ;;  %v4696_v16 = vsub.f32 %v304_v59, %v1801_v53  ;;  %v5262_v59 = vand.u32 4294901760, %v4681_v58  ;;  %p3397_p5 = pnand %p3396_p0, %p3390_p8 }
  0xfa   : > { %3104 = vmatprep.subr.bf16.mxu0 %v5530_v41  ;;  %v4674_v41 = vsub.f32 %v302_v11, %v1797_v44  ;;  %v1924_v44 = vand.u32 4294901760, %v1923_v23  ;;  %901 = vmatmul.mubr.f32.vlgmr.msra.gmra.mrb[0].mxu1 %v4291_v34  ;;  %v235_v23 = vld [vmem:[#allocation2 + $0x58] sm:$0xff]  ;;  %v1917_v53 = vsub.f32 %v4665_v9, %v1916_v50 }
  0xfb   : > { %v1911_v35 = vsub.f32 %v4634_v14, %v5531_v24  ;;  %v4679_v24 = vsub.f32 %v305_v5, %v1799_v21  ;;  %v4691_v5 = vand.u32 4294901760, %v313_v51  ;;  %2854 = vmatpush1.bf16.msra.mxu1 %v2853_v62  ;;  %v5536_v21 = vld [vmem:[#allocation20_spill] sm:$0xff]  ;;  %v5261_v39 = vand.u32 4294901760, %v4689_v52  ;;  %907 = vmatprep.mubr.f32.mxu1 %v4488_v15 }
  0xfc   : > { %v2857_v17 = vpack.c.bf16 %v5536_v21, %v5535_v36  ;;  %2856 = vmatprep.subr.bf16.mxu1 %v2855_v33  ;;  %v319_v43 = vsel %vm308_vm0, %v235_v23, 0  ;;  %v1940_v33 = vand.u32 4294901760, %v4696_v16  ;;  %v1947_v21 = vsub.f32 %v4681_v58, %v5262_v59 }
  0xfd   : > { %3106 = vmatpush1.bf16.msra.mxu0 %v4278_v37  ;;  %v1912_v11 = vand.u32 4294901760, %v1911_v35  ;;  %v1928_v35 = vand.u32 4294901760, %v4674_v41  ;;  %v4715_v62 = vsub.f32 %v313_v51, %v4691_v5  ;;  %v5264_v51 = vand.u32 4294901760, %v4698_v22 }
  0xfe   : > { %3108 = vmatprep.subr.bf16.mxu0 %v4655_v8  ;;  %909 = vmatmul.mubr.f32.gmra.mrb[2].mxu1 %v4495_v63  ;;  %v2863_v23 = vpack.c.bf16 %v3752_v3, %v3744_v60  ;;  %v1941_v3 = vsub.f32 %v4696_v16, %v1940_v33 }
  0xff   : > { %v3115_v55 = vpack.c.bf16 %v1924_v44, %v1912_v11  ;;  %v1929_v42 = vsub.f32 %v4674_v41, %v1928_v35  ;;  %2858 = vmatpush1.bf16.msra.mxu1 %v2857_v17  ;;  %v5537_v11 = vld [vmem:[#allocation23_spill] sm:$0xff]  ;;  %v5538_v44 = vld [vmem:[#allocation24_spill] sm:$0xff]  ;;  %v5265_v17 = vand.u32 4294901760, %v4715_v62  ;;  %915 = vmatprep.mubr.f32.mxu1 %v4509_v28 }
 0x100   : > { %1761 = vmatmul.mubr.f32.vlgmr.msra.gmra.mrb[0].mxu0 %v4291_v34  ;;  %v5263_v34 = vand.u32 4294901760, %v4679_v24  ;;  %v2861_v36 = vpack.c.bf16 %v5538_v44, %v5537_v11  ;;  %2860 = vmatprep.subr.bf16.mxu1 %v2859_v27  ;;  %v4748_v11 = vsub.f32 %v316_v30, %v4717_v26  ;;  %v4750_v44 = vand.u32 4294901760, %v319_v43  ;;  %v5539_v30 = vld [vmem:[#allocation26_spill] sm:$0xff] }
 0x101   : > { %1767 = vmatprep.mubr.f32.mxu0 %v4488_v15  ;;  %3110 = vmatpush1.bf16.msra.mxu0 %v4672_v40  ;;  %v1918_v27 = vand.u32 4294901760, %v1917_v53  ;;  %v1930_v60 = vand.u32 4294901760, %v1929_v42  ;;  %v2867_v53 = vpack.c.bf16 %v3803_v47, %v3787_v31  ;;  %v5541_v31 = vld [vmem:[#allocation30_spill] sm:$0xff]  ;;  %v5542_v47 = vld [vmem:[#allocation32_spill] sm:$0xff] }
 0x102   : > { %3112 = vmatprep.subr.bf16.mxu0 %v4685_v7  ;;  %v1935_v15 = vsub.f32 %v4679_v24, %v5263_v34  ;;  %917 = vmatmul.mubr.f32.gmra.mrb[4].mxu1 %v4514_v56 }
 0x103   : > { %2862 = vmatpush1.bf16.msra.mxu1 %v2861_v36  ;;  %923 = vmatprep.mubr.f32.mxu1 %v4534_v13  ;;  %v4772_v36 = vsub.f32 %v319_v43, %v4750_v44  ;;  %v2871_v43 = vpack.c.bf16 %v3831_v46, %v3826_v29  ;;  %v2481_v29 = vld [vmem:[%s5069_s2] sm:$0xff]  ;;  %v5543_v46 = vld [vmem:[#allocation34_spill] sm:$0xff] }
 0x104   : > { %1769 = vmatmul.mubr.f32.gmra.mrb[2].mxu0 %v4495_v63  ;;  %v1867_v63 = vsub.f32 %v4689_v52, %v5261_v39  ;;  %v5540_v39 = vld [vmem:[#allocation28_spill] sm:$0xff]  ;;  %v1936_v34 = vand.u32 4294901760, %v1935_v15  ;;  %2864 = vmatprep.subr.bf16.mxu1 %v2863_v23  ;;  %v1942_v15 = vand.u32 4294901760, %v1941_v3  ;;  %v2869_v23 = vpack.c.bf16 %v5542_v47, %v5541_v31  ;;  %v5548_v31 = vld [vmem:[#allocation43_spill] sm:$0xff] }
 0x105   : > { %1775 = vmatprep.mubr.f32.mxu0 %v4509_v28  ;;  %3114 = vmatpush1.bf16.msra.mxu0 %v4705_v61  ;;  %v2865_v59 = vpack.c.bf16 %v5540_v39, %v5539_v30  ;;  %v1948_v28 = vand.u32 4294901760, %v1947_v21  ;;  %v3481_v39 = vmov 0.0   ;;  %v3482_v30 = vmov 0   ;;  %v5549_v47 = vld [vmem:[#allocation44_spill] sm:$0xff] }
 0x106   : > { %3116 = vmatprep.subr.bf16.mxu0 %v3115_v55  ;;  %v1953_v55 = vsub.f32 %v4698_v22, %v5264_v51  ;;  %v1868_v42 = vand.u32 4294901760, %v1867_v63  ;;  %v1878_v51 = vsub.f32 %v4715_v62, %v5265_v17  ;;  %925 = vmatmul.mubr.f32.gmra.mrb[6].mxu1 %v4551_v6  ;;  %v3123_v3 = vpack.c.bf16 %v4636_v32, %v4634_v14 }
 0x107   : > { %2866 = vmatpush1.bf16.msra.mxu1 %v2865_v59  ;;  %v3119_v63 = vpack.c.bf16 %v1948_v28, %v1936_v34  ;;  %1125 = vmatprep.mubr.f32.mxu1 %v4288_v12  ;;  %v2483_v34 = vld [vmem:[%s5069_s2 + $0x10] sm:$0xff] }
 0x108   : > { %1777 = vmatmul.mubr.f32.gmra.mrb[4].mxu0 %v4514_v56  ;;  %v1888_v56 = vand.u32 4294901760, %v4748_v11  ;;  %v1954_v21 = vand.u32 4294901760, %v1953_v55  ;;  %2868 = vmatprep.subr.bf16.mxu1 %v2867_v53  ;;  %v1879_v17 = vand.u32 4294901760, %v1878_v51  ;;  %v5544_v51 = vld [vmem:[#allocation36_spill] sm:$0xff]  ;;  %v5545_v55 = vld [vmem:[#allocation38_spill] sm:$0xff] }
 0x109   : > { %1783 = vmatprep.mubr.f32.mxu0 %v4534_v13  ;;  %v3117_v13 = vpack.c.bf16 %v1930_v60, %v1918_v27  ;;  %3328 = vset.pattern.permute.xlu1 %v3482_v30  ;;  %v2873_v60 = vpack.c.bf16 %v5544_v51, %v5543_v46  ;;  %v2875_v28 = vpack.c.bf16 %v5545_v55, %v3872_v19  ;;  %v5546_v19 = vld [vmem:[#allocation39_spill] sm:$0xff]  ;;  %v5552_v51 = vld [vmem:[#allocation49_spill] sm:$0xff] }
 0x10a   : > { %v1889_v27 = vsub.f32 %v4748_v11, %v1888_v56  ;;  %3327 = vset.pattern.permute.xlu0 %v3482_v30  ;;  %v3121_v59 = vpack.c.bf16 %v1954_v21, %v1942_v15  ;;  %2497 = vperm.xlu1 %3328, %v2483_v34   ;;  %v2482_v15 = vld [vmem:[%s5069_s2 + $0x8] sm:$0xff]  ;;  %v2529_v30 = vsub.f32 0.0, %v2481_v29 }
 0x10b   : > { %2870 = vmatpush1.bf16.msra.mxu1 %v2869_v23  ;;  %2487 = vperm.xlu0 %3327, %v2481_v29   ;;  %v2879_v23 = vpack.c.bf16 %v5549_v47, %v5548_v31  ;;  %v3125_v29 = vpack.c.bf16 %v4674_v41, %v4665_v9  ;;  %v5558_v31 = vld [vmem:[#allocation59_spill] sm:$0xff]  ;;  %v5581_v9 = vand.u32 4294901760, %v4698_v22 }
 0x10c   : > { %1785 = vmatmul.mubr.f32.gmra.mrb[6].mxu0 %v4551_v6  ;;  %v1899_v6 = vand.u32 4294901760, %v4772_v36  ;;  %2872 = vmatprep.subr.bf16.mxu1 %v2871_v43  ;;  %v1890_v53 = vand.u32 4294901760, %v1889_v27  ;;  %v5550_v27 = vld [vmem:[#allocation45_spill] sm:$0xff] }
 0x10d   : > { %1863 = vmatprep.mubr.f32.mxu0 %v3481_v39  ;;  %v3145_v41 = vpack.c.bf16 %v5581_v9, %v1940_v33  ;;  %v5591_v33 = vld [vmem:[#allocation78_spill] sm:$0xff] }
 0x10f   : > { %2874 = vmatpush1.bf16.msra.mxu1 %v2873_v60  ;;  %2492 = vperm.xlu0 %3327, %v2482_v15   ;;  %v5553_v60 = vld [vmem:[#allocation50_spill] sm:$0xff] }
 0x110   : > { %1869 = vmatmul.mubr.f32.vlgmr.msra.gmra.mrb[0].mxu0 %v1868_v42  ;;  %v1900_v42 = vsub.f32 %v4772_v36, %v1899_v6  ;;  %2876 = vmatprep.subr.bf16.mxu1 %v2875_v28  ;;  %v2531_v28 = vsub.f32 0.0, %v2483_v34  ;;  %v3129_v34 = vpack.c.bf16 %v4698_v22, %v4696_v16  ;;  %v5588_v16 = vld [vmem:[#allocation72_spill] sm:$0xff]  ;;  %v5589_v22 = vld [vmem:[#allocation75_spill] sm:$0xff] }
 0x111   : > { %1874 = vmatprep.mubr.f32.mxu0 %v3481_v39  ;;  %3118 = vmatpush1.bf16.msra.mxu0 %v3117_v13  ;;  %v2484_v13 = vld [vmem:[%s5069_s2 + $0x18] sm:$0xff] }
 0x112   : > { %3120 = vmatprep.subr.bf16.mxu0 %v3119_v63  ;;  %2502 = vperm.xlu1 %3328, %v2484_v13   ;;  %v2530_v63 = vsub.f32 0.0, %v2482_v15  ;;  %v1901_v43 = vand.u32 4294901760, %v1900_v42  ;;  %v2532_v55 = vsub.f32 0.0, %v2484_v13  ;;  %v5555_v42 = vld [vmem:[#allocation53_spill] sm:$0xff] }
 0x113   : > { %2535 = vperm.xlu0 %3327, %v2529_v30   ;;  %v2895_v30 = vpack.c.bf16 %v5474_v20, %v5472_v45  ;;  %v2903_v20 = vpack.c.bf16 %v5508_v49, %v5506_v4  ;;  %v2907_v49 = vpack.c.bf16 %v4217_v54, %v5514_v10  ;;  %v5567_v4 = vld [vmem:[#allocation89_spill] sm:$0xff]  ;;  %v5572_v10 = vld [vmem:[#allocation96_spill] sm:$0xff] }
 0x114   : > { %1880 = vmatmul.mubr.f32.gmra.mrb[2].mxu0 %v1879_v17  ;;  %v5547_v17 = vld [vmem:[#allocation41_spill] sm:$0xff] }
 0x115   : > { %1885 = vmatprep.mubr.f32.mxu0 %v3481_v39  ;;  %3122 = vmatpush1.bf16.msra.mxu0 %v3121_v59  ;;  %v2877_v21 = vpack.c.bf16 %v5547_v17, %v5546_v19  ;;  %v5551_v59 = vld [vmem:[#allocation47_spill] sm:$0xff]  ;;  %v3127_v19 = vpack.c.bf16 %v4681_v58, %v4679_v24 }
 0x116   : > { %3124 = vmatprep.subr.bf16.mxu0 %v3123_v3  ;;  %v2881_v46 = vpack.c.bf16 %v5551_v59, %v5550_v27  ;;  %v2883_v3 = vpack.c.bf16 %v5553_v60, %v5552_v51  ;;  %2540 = vperm.xlu1 %3328, %v2530_v63   ;;  %v5556_v17 = vld [vmem:[#allocation55_spill] sm:$0xff]  ;;  %v5560_v63 = vld [vmem:[#allocation66_spill] sm:$0xff]  ;;  %v2899_v59 = vpack.c.bf16 %v5502_v48, %v5500_v0  ;;  %v5565_v48 = vand.u32 4294901760, %v4634_v14 }
 0x117   : > { %2878 = vmatpush1.bf16.msra.mxu1 %v2877_v21  ;;  %v2887_v13 = vpack.c.bf16 %v5460_v18, %v5556_v17  ;;  %2545 = vperm.xlu0 %3327, %v2531_v28   ;;  %v5557_v21 = vld [vmem:[#allocation57_spill] sm:$0xff]  ;;  %v5559_v18 = vld [vmem:[#allocation64_spill] sm:$0xff]  ;;  %v5564_v51 = vld [vmem:[#allocation82_spill] sm:$0xff]  ;;  %v2905_v0 = vpack.c.bf16 %v4192_v57, %v4182_v2  ;;  %v5566_v60 = vand.u32 4294901760, %v4636_v32  ;;  %v5578_v17 = vand.u32 4294901760, %v4689_v52 }
 0x118   : > { %1891 = vmatmul.mubr.f32.gmra.mrb[4].mxu0 %v1890_v53  ;;  %2880 = vmatprep.subr.bf16.mxu1 %v2879_v23  ;;  %v5554_v53 = vld [vmem:[#allocation51_spill] sm:$0xff]  ;;  %v2889_v47 = vpack.c.bf16 %v5558_v31, %v5557_v21  ;;  %v2891_v23 = vpack.c.bf16 %v5467_v1, %v5464_v38  ;;  %v5562_v38 = vld [vmem:[#allocation74_spill] sm:$0xff]  ;;  %v5570_v32 = vld [vmem:[#allocation93_spill] sm:$0xff] }
 0x119   : > { %1896 = vmatprep.mubr.f32.mxu0 %v3481_v39  ;;  %v2885_v15 = vpack.c.bf16 %v5555_v42, %v5554_v53  ;;  %v5561_v1 = vld [vmem:[#allocation71_spill] sm:$0xff]  ;;  %v5569_v14 = vld [vmem:[#allocation94_spill] sm:$0xff]  ;;  %v5576_v42 = vand.u32 4294901760, %v4679_v24  ;;  %v5583_v24 = vand.u32 4294901760, %v4715_v62  ;;  %v5587_v21 = vld [vmem:[#allocation21_spill] sm:$0xff] }
 0x11a   : > { %2550 = vperm.xlu1 %3328, %v2532_v55   ;;  %v2897_v27 = vpack.c.bf16 %v5562_v38, %v5561_v1  ;;  %v5568_v57 = vld [vmem:[#allocation91_spill] sm:$0xff]  ;;  %v5571_v54 = vpack.c.bf16 %v5569_v14, %v5570_v32  ;;  %v5592_v31 = vld [vmem:[#allocation25_spill] sm:$0xff]  ;;  %v5608_v1 = vld [vmem:[#allocation60_spill] sm:$0xff] }
 0x11b   : > { %2882 = vmatpush1.bf16.msra.mxu1 %v2881_v46  ;;  %v5563_v46 = vld [vmem:[#allocation80_spill] sm:$0xff]  ;;  %v2909_v2 = vpack.c.bf16 %v5568_v57, %v5567_v4  ;;  %v5573_v55 = vld [vmem:[#allocation95_spill] sm:$0xff]  ;;  %v5609_v38 = vld [vmem:[#allocation65_spill] sm:$0xff] }
 0x11c   : > { %1902 = vmatmul.mubr.f32.gmra.mrb[6].mxu0 %v1901_v43  ;;  %2884 = vmatprep.subr.bf16.mxu1 %v2883_v3  ;;  %v2893_v43 = vpack.c.bf16 %v5560_v63, %v5559_v18  ;;  %v2901_v45 = vpack.c.bf16 %v5564_v51, %v5563_v46  ;;  %v3139_v3 = vpack.c.bf16 %v5566_v60, %v5565_v48  ;;  %v5575_v53 = vld [vmem:[#allocation11_spill] sm:$0xff]  ;;  %v5602_v18 = vld [vmem:[#allocation42_spill] sm:$0xff]  ;;  %v5604_v63 = vld [vmem:[#allocation48_spill] sm:$0xff]  ;;  %v5622_v48 = vand.u32 4294901760, %v5588_v16 }
 0x11d   : > { %2012 = vmatprep.mubr.f32.mxu0 %v3481_v39  ;;  %v5574_v28 = vpack.c.bf16 %v5572_v10, %v5573_v55  ;;  %v5614_v46 = vld [vmem:[#allocation83_spill] sm:$0xff]  ;;  %v5615_v51 = vld [vmem:[#allocation86_spill] sm:$0xff]  ;;  %v5623_v60 = vand.u32 4294901760, %v5589_v22 }
 0x11f   : > { %2886 = vmatpush1.bf16.msra.mxu1 %v2885_v15  ;;  %v5577_v15 = vand.u32 4294901760, %v4681_v58  ;;  %v5584_v58 = vld [vmem:[#allocation62_spill] sm:$0xff] }
 0x120   : > { %2014 = vmatmul.mubr.f32.vlgmr.msra.gmra.mrb[0].mxu0 %v4667_v25  ;;  %2888 = vmatprep.subr.bf16.mxu1 %v2887_v13  ;;  %v5579_v13 = vld [vmem:[#allocation97_spill] sm:$0xff] }
 0x121   : > { %2019 = vmatprep.mubr.f32.mxu0 %v3481_v39  ;;  %3126 = vmatpush1.bf16.msra.mxu0 %v3125_v29  ;;  %v3141_v29 = vpack.c.bf16 %v1928_v35, %v1916_v50  ;;  %v5582_v50 = vld [vmem:[#allocation15_spill] sm:$0xff]  ;;  %v5586_v35 = vld [vmem:[#allocation18_spill] sm:$0xff] }
 0x122   : > { %3128 = vmatprep.subr.bf16.mxu0 %v3127_v19  ;;  %v3143_v19 = vpack.c.bf16 %v5577_v15, %v5576_v42 }
 0x123   : > { %2890 = vmatpush1.bf16.msra.mxu1 %v2889_v47  ;;  %v5596_v47 = vld [vmem:[#allocation29_spill] sm:$0xff] }
 0x124   : > { %2021 = vmatmul.mubr.f32.gmra.mrb[2].mxu0 %v4691_v5  ;;  %2892 = vmatprep.subr.bf16.mxu1 %v2891_v23  ;;  %v5597_v23 = vld [vmem:[#allocation31_spill] sm:$0xff] }
 0x125   : > { %2026 = vmatprep.mubr.f32.mxu0 %v3481_v39  ;;  %3130 = vmatpush1.bf16.msra.mxu0 %v3129_v34  ;;  %v5580_v34 = vld [vmem:[#allocation14_spill] sm:$0xff] }
 0x126   : > { %3132 = vmatprep.subr.bf16.mxu0 %v4655_v8 }
 0x127   : > { %2894 = vmatpush1.bf16.msra.mxu1 %v2893_v43  ;;  %v5606_v43 = vld [vmem:[#allocation54_spill] sm:$0xff] }
 0x128   : > { %2028 = vmatmul.mubr.f32.gmra.mrb[4].mxu0 %v4717_v26  ;;  %2896 = vmatprep.subr.bf16.mxu1 %v2895_v30  ;;  %v5607_v30 = vld [vmem:[#allocation58_spill] sm:$0xff] }
 0x129   : > { %2033 = vmatprep.mubr.f32.mxu0 %v3481_v39 }
 0x12b   : > { %2898 = vmatpush1.bf16.msra.mxu1 %v2897_v27  ;;  %v5611_v27 = vld [vmem:[#allocation73_spill] sm:$0xff] }
 0x12c   : > { %2035 = vmatmul.mubr.f32.gmra.mrb[6].mxu0 %v4750_v44  ;;  %2900 = vmatprep.subr.bf16.mxu1 %v2899_v59  ;;  %v5612_v59 = vld [vmem:[#allocation76_spill] sm:$0xff] }
 0x12d   : > { %2121 = vmatprep.mubr.f32.mxu0 %v3481_v39 }
 0x12f   : > { %2902 = vmatpush1.bf16.msra.mxu1 %v2901_v45  ;;  %v5616_v45 = vld [vmem:[#allocation87_spill] sm:$0xff] }
 0x130   : > { %2124 = vmatmul.mubr.f32.vlgmr.msra.gmra.mrb[0].mxu0 %v4689_v52  ;;  %2904 = vmatprep.subr.bf16.mxu1 %v2903_v20  ;;  %v5585_v52 = vld [vmem:[#allocation70_spill] sm:$0xff]  ;;  %v5620_v20 = vand.u32 4294901760, %v5584_v58 }
 0x131   : > { %2129 = vmatprep.mubr.f32.mxu0 %v3481_v39  ;;  %3134 = vmatpush1.bf16.msra.mxu0 %v4672_v40 }
 0x132   : > { %3136 = vmatprep.subr.bf16.mxu0 %v4685_v7 }
 0x133   : > { %2906 = vmatpush1.bf16.msra.mxu1 %v2905_v0  ;;  %v5621_v0 = vand.u32 4294901760, %v5585_v52 }
 0x134   : > { %2132 = vmatmul.mubr.f32.gmra.mrb[2].mxu0 %v4715_v62  ;;  %2908 = vmatprep.subr.bf16.mxu1 %v2907_v49  ;;  %v5590_v62 = vld [vmem:[#allocation22_spill] sm:$0xff] }
 0x135   : > { %2137 = vmatprep.mubr.f32.mxu0 %v3481_v39  ;;  %3138 = vmatpush1.bf16.msra.mxu0 %v4705_v61 }
 0x136   : > { %3140 = vmatprep.subr.bf16.mxu0 %v3139_v3  ;;  %v5624_v3 = vand.u32 4294901760, %v5591_v33 }
 0x137   : > { %2910 = vmatpush1.bf16.msra.mxu1 %v2909_v2 }
 0x138   : > { %2140 = vmatmul.mubr.f32.gmra.mrb[4].mxu0 %v4748_v11  ;;  %2912 = vmatprep.subr.bf16.mxu1 %v5571_v54  ;;  %v5594_v11 = vld [vmem:[#allocation27_spill] sm:$0xff] }
 0x139   : > { %2145 = vmatprep.mubr.f32.mxu0 %v3481_v39 }
 0x13b   : > { %2914 = vmatpush1.bf16.msra.mxu1 %v5574_v28 }
 0x13c   : > { %2148 = vmatmul.mubr.f32.gmra.mrb[6].mxu0 %v4772_v36  ;;  %2916 = vmatprep.subr.bf16.mxu1 %v5575_v53  ;;  %v5598_v36 = vld [vmem:[#allocation33_spill] sm:$0xff] }
 0x13d   : > { %2226 = vmatprep.mubr.f32.mxu0 %v3481_v39 }
 0x13e   : > { %1128 = vmatmul.mubr.f32.vlgmr.msra.gmra.mrb[0].mxu1 %v5579_v13 }
 0x13f   : > { %2918 = vmatpush1.bf16.msra.mxu1 %v5580_v34  ;;  %1135 = vmatprep.mubr.f32.mxu1 %v5584_v58 }
 0x140   : > { %2230 = vmatmul.mubr.f32.vlgmr.msra.gmra.mrb[0].mxu0 %v5578_v17  ;;  %2920 = vmatprep.subr.bf16.mxu1 %v5582_v50 }
 0x141   : > { %2235 = vmatprep.mubr.f32.mxu0 %v3481_v39  ;;  %3142 = vmatpush1.bf16.msra.mxu0 %v3141_v29 }
 0x142   : > { %3144 = vmatprep.subr.bf16.mxu0 %v3143_v19  ;;  %1138 = vmatmul.mubr.f32.gmra.mrb[2].mxu1 %v5585_v52 }
 0x143   : > { %2922 = vmatpush1.bf16.msra.mxu1 %v5586_v35  ;;  %1145 = vmatprep.mubr.f32.mxu1 %v5588_v16 }
 0x144   : > { %2239 = vmatmul.mubr.f32.gmra.mrb[2].mxu0 %v5583_v24  ;;  %2924 = vmatprep.subr.bf16.mxu1 %v5587_v21 }
 0x145   : > { %2244 = vmatprep.mubr.f32.mxu0 %v3481_v39  ;;  %3146 = vmatpush1.bf16.msra.mxu0 %v3145_v41 }
 0x146   : > { %3148 = vmatprep.subr.bf16.mxu0 %v4655_v8  ;;  %1148 = vmatmul.mubr.f32.gmra.mrb[4].mxu1 %v5589_v22  ;;  %v5593_v8 = vld [vmem:[#allocation56_spill] sm:$0xff] }
 0x147   : > { %2926 = vmatpush1.bf16.msra.mxu1 %v5590_v62  ;;  %1155 = vmatprep.mubr.f32.mxu1 %v5591_v33 }
 0x148   : > { %2248 = vmatmul.mubr.f32.gmra.mrb[4].mxu0 %v1888_v56  ;;  %2928 = vmatprep.subr.bf16.mxu1 %v5592_v31  ;;  %v5595_v56 = vand.u32 4294901760, %v4288_v12  ;;  %v5599_v12 = vld [vmem:[#allocation35_spill] sm:$0xff] }
 0x149   : > { %2253 = vmatprep.mubr.f32.mxu0 %v3481_v39 }
 0x14a   : > { %1158 = vmatmul.mubr.f32.gmra.mrb[6].mxu1 %v5593_v8 }
 0x14b   : > { %2930 = vmatpush1.bf16.msra.mxu1 %v5594_v11  ;;  %1295 = vmatprep.mubr.f32.mxu1 %v5595_v56 }
 0x14c   : > { %2257 = vmatmul.mubr.f32.gmra.mrb[6].mxu0 %v1899_v6  ;;  %2932 = vmatprep.subr.bf16.mxu1 %v5596_v47  ;;  %v5600_v6 = vld [vmem:[#allocation37_spill] sm:$0xff] }
 0x14d   : > { %2351 = vmatprep.mubr.f32.mxu0 %v3481_v39 }
 0x14f   : > { %2934 = vmatpush1.bf16.msra.mxu1 %v5597_v23 }
 0x150   : > { %2353 = vmatmul.mubr.f32.vlgmr.msra.gmra.mrb[0].mxu0 %v4667_v25  ;;  %2936 = vmatprep.subr.bf16.mxu1 %v5598_v36 }
 0x151   : > { %2358 = vmatprep.mubr.f32.mxu0 %v3481_v39  ;;  %3150 = vmatpush1.bf16.msra.mxu0 %v4672_v40  ;;  %v5601_v40 = vld [vmem:[#allocation40_spill] sm:$0xff] }
 0x152   : > { %3152 = vmatprep.subr.bf16.mxu0 %v4685_v7  ;;  %v5603_v7 = vld [vmem:[#allocation46_spill] sm:$0xff] }
 0x153   : > { %2938 = vmatpush1.bf16.msra.mxu1 %v5599_v12 }
 0x154   : > { %2360 = vmatmul.mubr.f32.gmra.mrb[2].mxu0 %v4691_v5  ;;  %2940 = vmatprep.subr.bf16.mxu1 %v5600_v6 }
 0x155   : > { %2365 = vmatprep.mubr.f32.mxu0 %v3481_v39  ;;  %3154 = vmatpush1.bf16.msra.mxu0 %v4705_v61  ;;  %v5605_v61 = vld [vmem:[#allocation52_spill] sm:$0xff] }
 0x157   : > { %2942 = vmatpush1.bf16.msra.mxu1 %v5601_v40 }
 0x158   : > { %2367 = vmatmul.mubr.f32.gmra.mrb[4].mxu0 %v4717_v26  ;;  %2944 = vmatprep.subr.bf16.mxu1 %v5602_v18 }
 0x159   : > { %2372 = vmatprep.mubr.f32.mxu0 %v3481_v39 }
 0x15b   : > { %2946 = vmatpush1.bf16.msra.mxu1 %v5603_v7 }
 0x15c   : > { %2374 = vmatmul.mubr.f32.gmra.mrb[6].mxu0 %v4750_v44  ;;  %2948 = vmatprep.subr.bf16.mxu1 %v5604_v63 }
 0x15d   : > { %2452 = vmatprep.mubr.f32.mxu0 %v3481_v39 }
 0x15f   : > { %2950 = vmatpush1.bf16.msra.mxu1 %v5605_v61 }
 0x160   : > { %2454 = vmatmul.mubr.f32.vlgmr.msra.gmra.mrb[0].mxu0 %v4667_v25  ;;  %2952 = vmatprep.subr.bf16.mxu1 %v5606_v43  ;;  %v5610_v25 = vld [vmem:[#allocation67_spill] sm:$0xff] }
 0x161   : > { %2459 = vmatprep.mubr.f32.mxu0 %v3481_v39 }
 0x163   : > { %2954 = vmatpush1.bf16.msra.mxu1 %v5607_v30 }
 0x164   : > { %2461 = vmatmul.mubr.f32.gmra.mrb[2].mxu0 %v4691_v5  ;;  %2956 = vmatprep.subr.bf16.mxu1 %v5608_v1  ;;  %v5613_v5 = vld [vmem:[#allocation81_spill] sm:$0xff] }
 0x165   : > { %2466 = vmatprep.mubr.f32.mxu0 %v3481_v39 }
 0x167   : > { %2958 = vmatpush1.bf16.msra.mxu1 %v5609_v38 }
 0x168   : > { %2468 = vmatmul.mubr.f32.gmra.mrb[4].mxu0 %v4717_v26  ;;  %2960 = vmatprep.subr.bf16.mxu1 %v5610_v25  ;;  %v5617_v26 = vld [vmem:[#allocation90_spill] sm:$0xff] }
 0x169   : > { %2473 = vmatprep.mubr.f32.mxu0 %v3481_v39  ;;  %v5618_v39 = vld [vmem:[#allocation92_spill] sm:$0xff] }
 0x16b   : > { %2962 = vmatpush1.bf16.msra.mxu1 %v5611_v27 }
 0x16c   : > { %2475 = vmatmul.mubr.f32.gmra.mrb[6].mxu0 %v4750_v44  ;;  %2964 = vmatprep.subr.bf16.mxu1 %v5612_v59  ;;  %v5619_v44 = vand.u32 4294901760, %v5579_v13 }
 0x16f   : > { %2966 = vmatpush1.bf16.msra.mxu1 %v5613_v5 }
 0x170   : > { %2968 = vmatprep.subr.bf16.mxu1 %v5614_v46 }
 0x173   : > { %2970 = vmatpush1.bf16.msra.mxu1 %v5615_v51 }
 0x174   : > { %2972 = vmatprep.subr.bf16.mxu1 %v5616_v45 }
 0x177   : > { %2974 = vmatpush1.bf16.msra.mxu1 %v5617_v26 }
 0x178   : > { %2976 = vmatprep.subr.bf16.mxu1 %v5618_v39 }
 0x17b   : > { %2978 = vmatpush1.bf16.msra.mxu1 %v4278_v37  ;;  %v5625_v37 = vand.u32 4294901760, %v5593_v8 }
 0x17e   : > { %1299 = vmatmul.mubr.f32.vlgmr.msra.gmra.mrb[0].mxu1 %v5619_v44 }
 0x17f   : > { %1307 = vmatprep.mubr.f32.mxu1 %v5620_v20 }
 0x182   : > { %1311 = vmatmul.mubr.f32.gmra.mrb[2].mxu1 %v5621_v0 }
 0x183   : > { %1319 = vmatprep.mubr.f32.mxu1 %v5622_v48 }
 0x186   : > { %1323 = vmatmul.mubr.f32.gmra.mrb[4].mxu1 %v5623_v60 }
 0x187   : > { %1331 = vmatprep.mubr.f32.mxu1 %v5624_v3 }
 0x189   : > { %v4982_v28 = vpop.permute.xlu1 %2497 }
 0x18a   : > { %1335 = vmatmul.mubr.f32.gmra.mrb[6].mxu1 %v5625_v37  ;;  %v2488_v55 = vpop.permute.xlu0 %2487 }
 0x18e   : > { %v2493_v29 = vpop.permute.xlu0 %2492 }
 0x191   : > { %v4984_v53 = vpop.permute.xlu1 %2502 }
 0x192   : > { %v2536_v17 = vpop.permute.xlu0 %2535 }
 0x195   : > { %v2541_v16 = vpop.permute.xlu1 %2540 }
 0x196   : > { %v2546_v61 = vpop.permute.xlu0 %2545 }
 0x199   : > { %v2551_v44 = vpop.permute.xlu1 %2550 }
 0x233   : > { %v2455_v49 = vpop.f32.mrb[0].mxu0 }
 0x234   : > { %v2457_v4 = vpop.f32.mrb[1].mxu0 }
 0x237   : > { %v2462_v57 = vpop.f32.mrb[2].mxu0 }
 0x238   : > { %v2464_v2 = vpop.f32.mrb[3].mxu0 }
 0x23b   : > { %v2469_v14 = vpop.f32.mrb[4].mxu0 }
 0x23c   : > { %v2471_v32 = vpop.f32.mrb[5].mxu0 }
 0x23f   : > { %v4978_v54 = vpop.f32.mrb[6].mxu0 }
 0x240   : > { %v4980_v10 = vpop.f32.mrb[7].mxu0 }
 0x251   : > { %v1300_v42 = vpop.f32.mrb[0].mxu1 }
 0x252   : > { %v3155_v15 = vadd.f32 %v2455_v49, %v1300_v42  ;;  %v1302_v19 = vpop.f32.mrb[1].mxu1 }
 0x253   : > { %v3156_v13 = vadd.f32 %v2457_v4, %v1302_v19 }
 0x254   : > { %vm2505_vm1 = vcmp.gt.f32.partialorder %v3155_v15, %v2488_v55  ;;  %v2513_v34 = vsub.f32 %v3155_v15, %v2488_v55  ;;  %vm2553_vm2 = vcmp.lt.f32.partialorder %v3155_v15, %v2536_v17  ;;  %v2561_v9 = vadd.f32 %v3155_v15, %v2488_v55 }
 0x255   : > { %vm2506_vm3 = vcmp.gt.f32.partialorder %v3156_v13, %v2488_v55  ;;  %v2514_v41 = vsub.f32 %v3156_v13, %v2488_v55  ;;  %vm2554_vm4 = vcmp.lt.f32.partialorder %v3156_v13, %v2536_v17  ;;  %v2562_v50 = vadd.f32 %v3156_v13, %v2488_v55  ;;  %v1312_v24 = vpop.f32.mrb[2].mxu1 }
 0x256   : > { %v2521_v58 = vsel %vm2505_vm1, %v2513_v34, 0.0  ;;  %v2569_v52 = vsel %vm2553_vm2, %v2561_v9, 0.0  ;;  %v3157_v35 = vadd.f32 %v2462_v57, %v1312_v24  ;;  %v1314_v21 = vpop.f32.mrb[3].mxu1 }
 0x257   : > { %v2577_v22 = vadd.f32 %v2569_v52, %v2521_v58  ;;  %v2522_v62 = vsel %vm2506_vm3, %v2514_v41, 0.0  ;;  %v2570_v33 = vsel %vm2554_vm4, %v2562_v50, 0.0  ;;  %v3158_v31 = vadd.f32 %v2464_v2, %v1314_v21 }
 0x258   : > { %v2578_v8 = vadd.f32 %v2570_v33, %v2522_v62  ;;  %vm2507_vm5 = vcmp.gt.f32.partialorder %v3157_v35, %v2493_v29  ;;  %v2515_v11 = vsub.f32 %v3157_v35, %v2493_v29  ;;  %vm2555_vm6 = vcmp.lt.f32.partialorder %v3157_v35, %v2541_v16 }
 0x259   : > { %2585 = vst [vmem:[%s4987_s9] sm:$0xff] %v2577_v22  ;;  %v2563_v56 = vadd.f32 %v3157_v35, %v2493_v29  ;;  %vm2508_vm7 = vcmp.gt.f32.partialorder %v3158_v31, %v2493_v29  ;;  %v2516_v47 = vsub.f32 %v3158_v31, %v2493_v29  ;;  %vm2556_vm8 = vcmp.lt.f32.partialorder %v3158_v31, %v2541_v16  ;;  %v1324_v23 = vpop.f32.mrb[4].mxu1 }
 0x25a   : > { %2586 = vst [vmem:[%s4987_s9 + $0x8] sm:$0xff] %v2578_v8  ;;  %v2523_v36 = vsel %vm2507_vm5, %v2515_v11, 0.0  ;;  %v2564_v12 = vadd.f32 %v3158_v31, %v2493_v29  ;;  %v3159_v6 = vadd.f32 %v2469_v14, %v1324_v23  ;;  %v1326_v40 = vpop.f32.mrb[5].mxu1 }
 0x25b   : > { %v2571_v18 = vsel %vm2555_vm6, %v2563_v56, 0.0  ;;  %v2524_v7 = vsel %vm2508_vm7, %v2516_v47, 0.0  ;;  %v3160_v63 = vadd.f32 %v2471_v32, %v1326_v40 }
 0x25c   : > { %v2579_v43 = vadd.f32 %v2571_v18, %v2523_v36  ;;  %v2572_v30 = vsel %vm2556_vm8, %v2564_v12, 0.0  ;;  %vm2509_vm9 = vcmp.gt.f32.partialorder %v3159_v6, %v4982_v28  ;;  %v2517_v1 = vsub.f32 %v3159_v6, %v4982_v28 }
 0x25d   : > { %v2580_v38 = vadd.f32 %v2572_v30, %v2524_v7  ;;  %vm2557_vm10 = vcmp.lt.f32.partialorder %v3159_v6, %v2546_v61  ;;  %v2565_v25 = vadd.f32 %v3159_v6, %v4982_v28  ;;  %vm2510_vm11 = vcmp.gt.f32.partialorder %v3160_v63, %v4982_v28  ;;  %v1336_v27 = vpop.f32.mrb[6].mxu1 }
 0x25e   : > { %2587 = vst [vmem:[%s4987_s9 + $0x10] sm:$0xff] %v2579_v43  ;;  %v2525_v59 = vsel %vm2509_vm9, %v2517_v1, 0.0  ;;  %v2518_v5 = vsub.f32 %v3160_v63, %v4982_v28  ;;  %vm2558_vm12 = vcmp.lt.f32.partialorder %v3160_v63, %v2546_v61  ;;  %v2566_v46 = vadd.f32 %v3160_v63, %v4982_v28  ;;  %v1338_v51 = vpop.f32.mrb[7].mxu1 }
 0x25f   : > { %2588 = vst [vmem:[%s4987_s9 + $0x18] sm:$0xff] %v2580_v38  ;;  %v2573_v45 = vsel %vm2557_vm10, %v2565_v25, 0.0  ;;  %v3161_v26 = vadd.f32 %v4978_v54, %v1336_v27  ;;  %v3162_v39 = vadd.f32 %v4980_v10, %v1338_v51 }
 0x260   : > { %v2581_v20 = vadd.f32 %v2573_v45, %v2525_v59  ;;  %v2526_v0 = vsel %vm2510_vm11, %v2518_v5, 0.0  ;;  %v2574_v48 = vsel %vm2558_vm12, %v2566_v46, 0.0 }
 0x261   : > { %v2582_v60 = vadd.f32 %v2574_v48, %v2526_v0  ;;  %vm2511_vm13 = vcmp.gt.f32.partialorder %v3161_v26, %v4984_v53  ;;  %v2519_v3 = vsub.f32 %v3161_v26, %v4984_v53  ;;  %vm2559_vm14 = vcmp.lt.f32.partialorder %v3161_v26, %v2551_v44 }
 0x262   : > { %2589 = vst [vmem:[%s4987_s9 + $0x20] sm:$0xff] %v2581_v20  ;;  %v2567_v37 = vadd.f32 %v3161_v26, %v4984_v53  ;;  %vm2512_vm15 = vcmp.gt.f32.partialorder %v3162_v39, %v4984_v53  ;;  %v2520_v49 = vsub.f32 %v3162_v39, %v4984_v53  ;;  %vm2560_vm0 = vcmp.lt.f32.partialorder %v3162_v39, %v2551_v44 }
 0x263   : > { %2590 = vst [vmem:[%s4987_s9 + $0x28] sm:$0xff] %v2582_v60  ;;  %v2527_v4 = vsel %vm2511_vm13, %v2519_v3, 0.0  ;;  %v2568_v57 = vadd.f32 %v3162_v39, %v4984_v53 }
 0x264   : > { %v2575_v2 = vsel %vm2559_vm14, %v2567_v37, 0.0  ;;  %v2528_v14 = vsel %vm2512_vm15, %v2520_v49, 0.0 }
 0x265   : > { %v2583_v32 = vadd.f32 %v2575_v2, %v2527_v4  ;;  %v2576_v54 = vsel %vm2560_vm0, %v2568_v57, 0.0 }
 0x266   : > { %v2584_v10 = vadd.f32 %v2576_v54, %v2528_v14 }
 0x267   : > { %2591 = vst [vmem:[%s4987_s9 + $0x30] sm:$0xff] %v2583_v32 }
 0x268   : > { %2592 = vst [vmem:[%s4987_s9 + $0x38] sm:$0xff] %v2584_v10 }
 0x269   : > { %3400 = shalt.err (!%p3397_p5)
}
 0x26a   : > { %s3401_s7 = scalar_lea.hbm %s5014_s4, 1024  ;;  %s3405_s11 = scalar_lea.hbm %s5070_s3, 2048 }
 0x26b   : > { %p3402_p9 = scmp.ne.s32.totalorder %s5014_s4, %s3401_s7  ;;  %p3406_p3 = scmp.lt.u32.totalorder %s5014_s4, %s5070_s3 }
 0x26c   : > { %p3407_p7 = scmp.lt.u32.totalorder %s3405_s11, %s3401_s7  ;;  %p3409_p4 = scmp.lt.u32.totalorder %s3401_s7, %s5014_s4 }
 0x26d   : > { %p3403_p1 = pnand %p3402_p9, %p3598_p10 }
 0x26e   : > { %p3408_p11 = por %p3407_p7, %p3406_p3 }
 0x26f   : > { %p3404_p2 = pneg %p3403_p1 }
 0x270   : > { %p3410_p6 = por %p3409_p4, %p3408_p11 }
 0x272   : > { %p3411_p8 = pnand %p3410_p6, %p3404_p2 }
 0x274   : > { %3414 = shalt.err (!%p3411_p8)
}
 0x275   : > { %s3484_s9 = smov 256   ;;  %s3485_s21 = smov 16  }
 0x276   : > { %3252 = dma.vmem_to_hbm [thread:$0]  (%p3598_p10), %s5016_s18, 1024, %s5014_s4, %s2594_s15, %s3484_s9, %s3484_s9, %s3485_s21  }
 0x277 PF: > { %s2624_s19 = sand.u32 1, %s3453_s12   ;;  %p5626_p12 = scmp.ne.s32.totalorder %s5269_s23, 0 }
 0x278   : > { %p5627_p13 = scmp.ge.s32.totalorder %s3473_s17, 2  ;;  %s2625_s30 = scalar_lea.sflag [#allocation4], %s2624_s19 }
 0x27a   : > { %p3263_p0 = pnand %p5627_p13, %p5626_p12 }
 0x27c   : > { %3448 = dma.done.wait (!%p3263_p0), %s2625_s30, 1024  }
 0x27d   : > { %3450 = vsyncadd (!%p3263_p0), %s2625_s30, 4294966272  ;;  %s20_s17 = sadd.s32 1, %s3473_s17   ;;  %s5628_s12 = smov %s3457_s13 }
 0x27e   : > { %p17_p5 = scmp.ge.s32.totalorder %s20_s17, 4   ;;  %s5629_s13 = smov %s3461_s14 }
 0x27f   : > { %s5630_s14 = smov %s3607_s5  ;;  %s5631_s15 = smov %s3469_s16 }
 0x280   : > { %s5632_s16 = smov %s5634_s28  ;;  %19 = sbr.rel (!%p17_p5) target bundleno = 7 (0x7), region = 82 }
 0x287   :  { %2630 = vsyncpa [#allocation3], 1 }
 0x288   :  { %2632 = vsyncpa [#allocation3 + $0x1], 1 }
 0x289   :  { %2633 = vsyncpa [#allocation6], 1 }
 0x28a   :  { %2635 = vsyncpa [#allocation6 + $0x1], 1 }
 0x28b   :  { %2636 = vsyncpa [#allocation4], 1 }
 0x28c   :  { %2638 = vsyncpa [#allocation4 + $0x1], 1 }

</bundles_post_ra>
